<compile_context>
chip_gen: v6e
topology: v6e:2x2x1
jax: 0.10.0
libtpu: 0.0.40
codegen_flags: <defaults>
</compile_context>

<pallas_src>
import functools
import math

import jax
import jax.numpy as jnp
import numpy as np
from jax.experimental import pallas as pl
from jax.experimental.pallas import tpu as pltpu


def _round_up(v, m):
    return ((v + m - 1) // m) * m


def _lstm_twin_kernel(*refs, tt, hidden, apply_ln):
    if apply_ln:
        (x_ref, wx_ref, wh_ref, b_ref, wfc_ref, bfc_ref, wln_ref, bln_ref,
         out_ref, st_ref, h_scr, c_scr, hs_scr) = refs
    else:
        (x_ref, wx_ref, wh_ref, b_ref, wfc_ref, bfc_ref,
         out_ref, st_ref, h_scr, c_scr, hs_scr) = refs
        wln_ref = bln_ref = None

    H = hidden
    B = h_scr.shape[0]

    @pl.when(pl.program_id(0) == 0)
    def _():
        h_scr[...] = jnp.zeros_like(h_scr)
        c_scr[...] = jnp.zeros_like(c_scr)

    w_h = wh_ref[...]                                        # (H, 4H) packed i|f|g|o

    # ---- hoisted input projection: one M = tt*B matmul per block, fused bias ----
    xproj = (jnp.dot(x_ref[...], wx_ref[...], preferred_element_type=jnp.float32)
             + jnp.broadcast_to(b_ref[...], (tt * B, 4 * H)))     # (tt*B, 4H)

    h = h_scr[...]                                           # (B, H) f32 carried state
    c = c_scr[...]                                           # (B, H) f32 carried state

    # ---- recurrence: one (B,H)x(H,4H) MXU call per step on the critical path ----
    # TODO(synk): for tt >> 16 switch to lax.fori_loop(unroll=k) with a dynamic
    # hs_scr store so vreg live ranges stay bounded (full static unroll spills).
    for s in range(tt):
        gates = xproj[s * B:(s + 1) * B, :] + jnp.dot(
            h, w_h, preferred_element_type=jnp.float32)          # (B, 4H)
        # TODO(synk): at production sizes make H a multiple of 128 (pad packed
        # gate columns) so these slices are whole-vreg / lane-aligned.
        i_g = jax.nn.sigmoid(gates[:, 0 * H:1 * H])
        f_g = jax.nn.sigmoid(gates[:, 1 * H:2 * H])
        g_g = jnp.tanh(gates[:, 2 * H:3 * H])
        o_g = jax.nn.sigmoid(gates[:, 3 * H:4 * H])
        c = f_g * c + i_g * g_g
        h = o_g * jnp.tanh(c)
        hs_scr[pl.ds(s * B, B), :] = h                       # stash h_t (flat slab)

    h_scr[...] = h
    c_scr[...] = c

    # ---- heads: single flattened matmul each, lane-dense (128-wide) stores ----
    slab = hs_scr[...]                                       # (tt*B, H)
    Cp = wfc_ref.shape[1]
    out = (jnp.dot(slab, wfc_ref[...], preferred_element_type=jnp.float32)
           + jnp.broadcast_to(bfc_ref[...], (tt * B, Cp)))
    out_ref[...] = out.astype(out_ref.dtype)

    if apply_ln:
        Hp = wln_ref.shape[1]
        st = (jnp.dot(slab, wln_ref[...], preferred_element_type=jnp.float32)
              + jnp.broadcast_to(bln_ref[...], (tt * B, Hp)))
        st_ref[...] = st.astype(st_ref.dtype)
    else:
        st_ref[...] = slab.astype(st_ref.dtype)


def rnn_lstm_twin_forward(x, params, *, reverse=False, tt=16):
    """x: (B, T, D). Returns (out (B, T, C), states (B, T, H))."""
    B, T, D = x.shape
    H = params["hidden"]
    C = params["num_classes"]
    Cp = params["w_fc"].shape[1]
    Hp = params["w_ln"].shape[1]

    # Pick the time-block size: tt*B must be a multiple of 8 sublanes.
    tt = min(tt, T)
    step = 8 // math.gcd(B, 8)
    tt = _round_up(max(tt, 1), step)
    T_pad = _round_up(T, tt)
    n_blk = T_pad // tt

    # Time-major, zero-padded, then flattened to (T_pad*B, D) so every block is
    # a dense (tt*B, D) slab (padded steps only touch state after real steps;
    # their outputs are sliced off below).
    x_tm = jnp.transpose(x, (1, 0, 2))
    if T_pad != T:
        x_tm = jnp.pad(x_tm, ((0, T_pad - T), (0, 0), (0, 0)))
    x_flat = x_tm.reshape(T_pad * B, D)

    st_lane = Hp if not reverse else H

    kernel = functools.partial(_lstm_twin_kernel, tt=tt, hidden=H,
                               apply_ln=not reverse)

    in_specs = [
        pl.BlockSpec((tt * B, D), lambda i: (i, 0)),         # x, tt steps / block
        pl.BlockSpec((D, 4 * H), lambda i: (0, 0)),          # W_ih packed i|f|g|o
        pl.BlockSpec((H, 4 * H), lambda i: (0, 0)),          # W_hh packed
        pl.BlockSpec((1, 4 * H), lambda i: (0, 0)),          # fused b_ih + b_hh
        pl.BlockSpec((H, Cp), lambda i: (0, 0)),             # fc weight^T (lane-padded)
        pl.BlockSpec((1, Cp), lambda i: (0, 0)),             # fc bias (lane-padded)
    ]
    inputs = [x_flat, params["w_ih"], params["w_hh"], params["b"],
              params["w_fc"], params["b_fc"]]
    if not reverse:
        in_specs += [pl.BlockSpec((H, Hp), lambda i: (0, 0)),    # ln weight^T
                     pl.BlockSpec((1, Hp), lambda i: (0, 0))]    # ln bias
        inputs += [params["w_ln"], params["b_ln"]]

    out_flat, st_flat = pl.pallas_call(
        kernel,
        out_shape=(jax.ShapeDtypeStruct((T_pad * B, Cp), x.dtype),
                   jax.ShapeDtypeStruct((T_pad * B, st_lane), x.dtype)),
        grid_spec=pltpu.PrefetchScalarGridSpec(
            num_scalar_prefetch=0,
            grid=(n_blk,),
            in_specs=in_specs,
            out_specs=[
                pl.BlockSpec((tt * B, Cp), lambda i: (i, 0)),        # out (flat)
                pl.BlockSpec((tt * B, st_lane), lambda i: (i, 0)),   # states (flat)
            ],
            scratch_shapes=[
                pltpu.VMEM((B, H), jnp.float32),          # h_t carried across blocks
                pltpu.VMEM((B, H), jnp.float32),          # c_t carried across blocks
                pltpu.VMEM((tt * B, H), jnp.float32),     # per-block hidden slab
            ],
        ),
        compiler_params=pltpu.CompilerParams(
            dimension_semantics=("arbitrary",)),          # time recurrence: sequential
    )(*inputs)

    out = out_flat.reshape(T_pad, B, Cp).transpose(1, 0, 2)[:, :T, :C]
    states = st_flat.reshape(T_pad, B, st_lane).transpose(1, 0, 2)[:, :T, :H]
    return out, states


def init_params(key, input_size, hidden_size, num_classes):
    """PyTorch-style U(-1/sqrt(H), 1/sqrt(H)) init, packed into the fused /
    lane-padded layouts the kernel expects (gate order i, f, g, o)."""
    H, D, C = hidden_size, input_size, num_classes
    Cp = _round_up(C, 128)
    Hp = _round_up(H, 128)
    k = 1.0 / np.sqrt(H)
    keys = jax.random.split(key, 8)
    w_ih = jax.random.uniform(keys[0], (4 * H, D), jnp.float32, -k, k)
    w_hh = jax.random.uniform(keys[1], (4 * H, H), jnp.float32, -k, k)
    b_ih = jax.random.uniform(keys[2], (4 * H,), jnp.float32, -k, k)
    b_hh = jax.random.uniform(keys[3], (4 * H,), jnp.float32, -k, k)
    w_fc = jax.random.uniform(keys[4], (C, H), jnp.float32, -k, k)
    b_fc = jax.random.uniform(keys[5], (C,), jnp.float32, -k, k)
    w_ln = jax.random.uniform(keys[6], (H, H), jnp.float32, -k, k)
    b_ln = jax.random.uniform(keys[7], (H,), jnp.float32, -k, k)

    w_fc_p = jnp.zeros((H, Cp), jnp.float32).at[:, :C].set(w_fc.T)
    b_fc_p = jnp.zeros((1, Cp), jnp.float32).at[0, :C].set(b_fc)
    w_ln_p = jnp.zeros((H, Hp), jnp.float32).at[:, :H].set(w_ln.T)
    b_ln_p = jnp.zeros((1, Hp), jnp.float32).at[0, :H].set(b_ln)

    return {
        "w_ih": w_ih.T,                      # (D, 4H), columns packed i|f|g|o
        "w_hh": w_hh.T,                      # (H, 4H)
        "b": (b_ih + b_hh).reshape(1, 4 * H),
        "w_fc": w_fc_p,                      # (H, Cp)  lane-padded to 128
        "b_fc": b_fc_p,                      # (1, Cp)
        "w_ln": w_ln_p,                      # (H, Hp)  lane-padded to 128
        "b_ln": b_ln_p,                      # (1, Hp)
        "num_classes": C,
        "hidden": H,
    }


def reference_forward(x, params, reverse=False):
    """Pure-JAX reference matching the PyTorch forward semantics."""
    B, T, D = x.shape
    H = params["hidden"]
    C = params["num_classes"]

    def step(carry, x_t):
        h, c = carry
        g = (jnp.dot(x_t, params["w_ih"]) + jnp.dot(h, params["w_hh"])
             + params["b"][0])
        i = jax.nn.sigmoid(g[:, 0 * H:1 * H])
        f = jax.nn.sigmoid(g[:, 1 * H:2 * H])
        gg = jnp.tanh(g[:, 2 * H:3 * H])
        o = jax.nn.sigmoid(g[:, 3 * H:4 * H])
        c_new = f * c + i * gg
        h_new = o * jnp.tanh(c_new)
        return (h_new, c_new), h_new

    init = (jnp.zeros((B, H), jnp.float32), jnp.zeros((B, H), jnp.float32))
    _, hs = jax.lax.scan(step, init, jnp.transpose(x, (1, 0, 2)))
    hs = jnp.transpose(hs, (1, 0, 2))                                  # (B, T, H)
    out = (jnp.dot(hs, params["w_fc"]) + params["b_fc"][0])[:, :, :C]  # (B, T, C)
    if reverse:
        states = hs
    else:
        states = (jnp.dot(hs, params["w_ln"]) + params["b_ln"][0])[:, :, :H]
    return out, states


if __name__ == "__main__":
    B, T, D, H, C = 2, 16, 16, 32, 10   # batch, seq, input_size, hidden, classes

    key = jax.random.PRNGKey(0)
    kx, kp = jax.random.split(key)
    x = jax.random.normal(kx, (B, T, D), jnp.float32)
    params = init_params(kp, D, H, C)

    for reverse in (False, True):
        out_ref, states_ref = reference_forward(x, params, reverse=reverse)
        # tt=8 exercises the multi-block h/c carry; tt=16 is a single block.
        for tt in (8, 16):
            out, states = rnn_lstm_twin_forward(x, params, reverse=reverse, tt=tt)
            out = jax.block_until_ready(out)
            states = jax.block_until_ready(states)
            np.testing.assert_allclose(np.asarray(out), np.asarray(out_ref),
                                       rtol=1e-4, atol=1e-4)
            np.testing.assert_allclose(np.asarray(states), np.asarray(states_ref),
                                       rtol=1e-4, atol=1e-4)
            assert out.shape == (B, T, C) and states.shape == (B, T, H)

    print("KERNEL_OK")
</pallas_src>

<mosaic_0001>
module attributes {stable_mosaic.version = 11 : i64} {
  func.func @_lstm_twin_kernel(%arg0: i32, %arg1: memref<16x16xf32, #tpu.memory_space<vmem>>, %arg2: memref<16x128xf32, #tpu.memory_space<vmem>>, %arg3: memref<32x128xf32, #tpu.memory_space<vmem>>, %arg4: memref<1x128xf32, #tpu.memory_space<vmem>>, %arg5: memref<32x128xf32, #tpu.memory_space<vmem>>, %arg6: memref<1x128xf32, #tpu.memory_space<vmem>>, %arg7: memref<32x128xf32, #tpu.memory_space<vmem>>, %arg8: memref<1x128xf32, #tpu.memory_space<vmem>>, %arg9: memref<16x128xf32, #tpu.memory_space<vmem>>, %arg10: memref<16x128xf32, #tpu.memory_space<vmem>>, %arg11: memref<2x32xf32, #tpu.memory_space<vmem>>, %arg12: memref<2x32xf32, #tpu.memory_space<vmem>>, %arg13: memref<16x32xf32, #tpu.memory_space<vmem>>) attributes {dimension_semantics = [#tpu.dimension_semantics<arbitrary>], iteration_bounds = array<i64: 2>, scalar_prefetch = 0 : i64, scratch_operands = 3 : i64, tpu.core_type = #tpu.core_type<tc>, window_params = [{transform_indices = @transform_0, window_bounds = array<i64: 16, 16>}, {pipeline_mode = #tpu.pipeline_mode<synchronous>, transform_indices = @transform_1, window_bounds = array<i64: 16, 128>}, {pipeline_mode = #tpu.pipeline_mode<synchronous>, transform_indices = @transform_2, window_bounds = array<i64: 32, 128>}, {pipeline_mode = #tpu.pipeline_mode<synchronous>, transform_indices = @transform_3, window_bounds = array<i64: 1, 128>}, {pipeline_mode = #tpu.pipeline_mode<synchronous>, transform_indices = @transform_4, window_bounds = array<i64: 32, 128>}, {pipeline_mode = #tpu.pipeline_mode<synchronous>, transform_indices = @transform_5, window_bounds = array<i64: 1, 128>}, {pipeline_mode = #tpu.pipeline_mode<synchronous>, transform_indices = @transform_6, window_bounds = array<i64: 32, 128>}, {pipeline_mode = #tpu.pipeline_mode<synchronous>, transform_indices = @transform_7, window_bounds = array<i64: 1, 128>}, {transform_indices = @transform_8, window_bounds = array<i64: 16, 128>}, {transform_indices = @transform_9, window_bounds = array<i64: 16, 128>}]} {
    %c0_i32 = arith.constant 0 : i32
    %0 = arith.cmpi eq, %arg0, %c0_i32 : i32
    %1 = arith.extui %0 : i1 to i32
    %c0_i32_0 = arith.constant 0 : i32
    %2 = arith.cmpi ne, %1, %c0_i32_0 : i32
    scf.if %2 {
      %cst_73 = arith.constant 0.000000e+00 : f32
      %262 = vector.broadcast %cst_73 : f32 to vector<2x32xf32>
      %c0_74 = arith.constant 0 : index
      %c0_75 = arith.constant 0 : index
      %263 = vector.load %arg11[%c0_74, %c0_75] : memref<2x32xf32, #tpu.memory_space<vmem>>, vector<2x32xf32>
      tpu.vector_store %arg11[%c0_74, %c0_75], %262 {strides = array<i32>} : memref<2x32xf32, #tpu.memory_space<vmem>>, vector<2x32xf32>,
      %cst_76 = arith.constant 0.000000e+00 : f32
      %264 = vector.broadcast %cst_76 : f32 to vector<2x32xf32>
      %c0_77 = arith.constant 0 : index
      %c0_78 = arith.constant 0 : index
      %265 = vector.load %arg12[%c0_77, %c0_78] : memref<2x32xf32, #tpu.memory_space<vmem>>, vector<2x32xf32>
      tpu.vector_store %arg12[%c0_77, %c0_78], %264 {strides = array<i32>} : memref<2x32xf32, #tpu.memory_space<vmem>>, vector<2x32xf32>,
    } else {
    }
    %c0 = arith.constant 0 : index
    %c0_1 = arith.constant 0 : index
    %3 = vector.load %arg3[%c0, %c0_1] : memref<32x128xf32, #tpu.memory_space<vmem>>, vector<32x128xf32>
    %c0_2 = arith.constant 0 : index
    %c0_3 = arith.constant 0 : index
    %4 = vector.load %arg1[%c0_2, %c0_3] : memref<16x16xf32, #tpu.memory_space<vmem>>, vector<16x16xf32>
    %c0_4 = arith.constant 0 : index
    %c0_5 = arith.constant 0 : index
    %5 = vector.load %arg2[%c0_4, %c0_5] : memref<16x128xf32, #tpu.memory_space<vmem>>, vector<16x128xf32>
    %cst = arith.constant dense<0.000000e+00> : vector<16x128xf32>
    %6 = tpu.matmul %4, %5, %cst {dimension_numbers = #tpu.dot_dimension_numbers<[1], [0], [0], [1], [0, 0, 1, 1], [], []>} : vector<16x16xf32>, vector<16x128xf32>, vector<16x128xf32> -> vector<16x128xf32>
    %c0_6 = arith.constant 0 : index
    %c0_7 = arith.constant 0 : index
    %7 = vector.load %arg4[%c0_6, %c0_7] : memref<1x128xf32, #tpu.memory_space<vmem>>, vector<1x128xf32>
    %8 = vector.shape_cast %7 : vector<1x128xf32> to vector<1x128xf32>
    %9 = vector.broadcast %8 : vector<1x128xf32> to vector<16x128xf32>
    %10 = arith.addf %6, %9 : vector<16x128xf32>
    %c0_8 = arith.constant 0 : index
    %c0_9 = arith.constant 0 : index
    %11 = vector.load %arg11[%c0_8, %c0_9] : memref<2x32xf32, #tpu.memory_space<vmem>>, vector<2x32xf32>
    %c0_10 = arith.constant 0 : index
    %c0_11 = arith.constant 0 : index
    %12 = vector.load %arg12[%c0_10, %c0_11] : memref<2x32xf32, #tpu.memory_space<vmem>>, vector<2x32xf32>
    %13 = vector.extract_strided_slice %10 {offsets = [0, 0], sizes = [2, 128], strides = [1, 1]} : vector<16x128xf32> to vector<2x128xf32>
    %cst_12 = arith.constant dense<0.000000e+00> : vector<2x128xf32>
    %14 = tpu.matmul %11, %3, %cst_12 {dimension_numbers = #tpu.dot_dimension_numbers<[1], [0], [0], [1], [0, 0, 1, 1], [], []>} : vector<2x32xf32>, vector<32x128xf32>, vector<2x128xf32> -> vector<2x128xf32>
    %15 = arith.addf %13, %14 : vector<2x128xf32>
    %16 = vector.extract_strided_slice %15 {offsets = [0, 0], sizes = [2, 32], strides = [1, 1]} : vector<2x128xf32> to vector<2x32xf32>
    %17 = arith.negf %16 : vector<2x32xf32>
    %18 = math.exp %17 : vector<2x32xf32>
    %cst_13 = arith.constant 1.000000e+00 : f32
    %19 = vector.broadcast %cst_13 : f32 to vector<2x32xf32>
    %20 = arith.addf %19, %18 : vector<2x32xf32>
    %21 = arith.divf %19, %20 : vector<2x32xf32>
    %22 = vector.extract_strided_slice %15 {offsets = [0, 32], sizes = [2, 32], strides = [1, 1]} : vector<2x128xf32> to vector<2x32xf32>
    %23 = arith.negf %22 : vector<2x32xf32>
    %24 = math.exp %23 : vector<2x32xf32>
    %cst_14 = arith.constant 1.000000e+00 : f32
    %25 = vector.broadcast %cst_14 : f32 to vector<2x32xf32>
    %26 = arith.addf %25, %24 : vector<2x32xf32>
    %27 = arith.divf %25, %26 : vector<2x32xf32>
    %28 = vector.extract_strided_slice %15 {offsets = [0, 64], sizes = [2, 32], strides = [1, 1]} : vector<2x128xf32> to vector<2x32xf32>
    %29 = math.tanh %28 : vector<2x32xf32>
    %30 = vector.extract_strided_slice %15 {offsets = [0, 96], sizes = [2, 32], strides = [1, 1]} : vector<2x128xf32> to vector<2x32xf32>
    %31 = arith.negf %30 : vector<2x32xf32>
    %32 = math.exp %31 : vector<2x32xf32>
    %cst_15 = arith.constant 1.000000e+00 : f32
    %33 = vector.broadcast %cst_15 : f32 to vector<2x32xf32>
    %34 = arith.addf %33, %32 : vector<2x32xf32>
    %35 = arith.divf %33, %34 : vector<2x32xf32>
    %36 = arith.mulf %27, %12 : vector<2x32xf32>
    %37 = arith.mulf %21, %29 : vector<2x32xf32>
    %38 = arith.addf %36, %37 : vector<2x32xf32>
    %39 = math.tanh %38 : vector<2x32xf32>
    %40 = arith.mulf %35, %39 : vector<2x32xf32>
    %c0_16 = arith.constant 0 : index
    %c0_17 = arith.constant 0 : index
    %41 = vector.load %arg13[%c0_16, %c0_17] : memref<16x32xf32, #tpu.memory_space<vmem>>, vector<2x32xf32>
    tpu.vector_store %arg13[%c0_16, %c0_17], %40 {strides = array<i32>} : memref<16x32xf32, #tpu.memory_space<vmem>>, vector<2x32xf32>,
    %42 = vector.extract_strided_slice %10 {offsets = [2, 0], sizes = [2, 128], strides = [1, 1]} : vector<16x128xf32> to vector<2x128xf32>
    %cst_18 = arith.constant dense<0.000000e+00> : vector<2x128xf32>
    %43 = tpu.matmul %40, %3, %cst_18 {dimension_numbers = #tpu.dot_dimension_numbers<[1], [0], [0], [1], [0, 0, 1, 1], [], []>} : vector<2x32xf32>, vector<32x128xf32>, vector<2x128xf32> -> vector<2x128xf32>
    %44 = arith.addf %42, %43 : vector<2x128xf32>
    %45 = vector.extract_strided_slice %44 {offsets = [0, 0], sizes = [2, 32], strides = [1, 1]} : vector<2x128xf32> to vector<2x32xf32>
    %46 = arith.negf %45 : vector<2x32xf32>
    %47 = math.exp %46 : vector<2x32xf32>
    %cst_19 = arith.constant 1.000000e+00 : f32
    %48 = vector.broadcast %cst_19 : f32 to vector<2x32xf32>
    %49 = arith.addf %48, %47 : vector<2x32xf32>
    %50 = arith.divf %48, %49 : vector<2x32xf32>
    %51 = vector.extract_strided_slice %44 {offsets = [0, 32], sizes = [2, 32], strides = [1, 1]} : vector<2x128xf32> to vector<2x32xf32>
    %52 = arith.negf %51 : vector<2x32xf32>
    %53 = math.exp %52 : vector<2x32xf32>
    %cst_20 = arith.constant 1.000000e+00 : f32
    %54 = vector.broadcast %cst_20 : f32 to vector<2x32xf32>
    %55 = arith.addf %54, %53 : vector<2x32xf32>
    %56 = arith.divf %54, %55 : vector<2x32xf32>
    %57 = vector.extract_strided_slice %44 {offsets = [0, 64], sizes = [2, 32], strides = [1, 1]} : vector<2x128xf32> to vector<2x32xf32>
    %58 = math.tanh %57 : vector<2x32xf32>
    %59 = vector.extract_strided_slice %44 {offsets = [0, 96], sizes = [2, 32], strides = [1, 1]} : vector<2x128xf32> to vector<2x32xf32>
    %60 = arith.negf %59 : vector<2x32xf32>
    %61 = math.exp %60 : vector<2x32xf32>
    %cst_21 = arith.constant 1.000000e+00 : f32
    %62 = vector.broadcast %cst_21 : f32 to vector<2x32xf32>
    %63 = arith.addf %62, %61 : vector<2x32xf32>
    %64 = arith.divf %62, %63 : vector<2x32xf32>
    %65 = arith.mulf %56, %38 : vector<2x32xf32>
    %66 = arith.mulf %50, %58 : vector<2x32xf32>
    %67 = arith.addf %65, %66 : vector<2x32xf32>
    %68 = math.tanh %67 : vector<2x32xf32>
    %69 = arith.mulf %64, %68 : vector<2x32xf32>
    %c2 = arith.constant 2 : index
    %c0_22 = arith.constant 0 : index
    %70 = vector.load %arg13[%c2, %c0_22] : memref<16x32xf32, #tpu.memory_space<vmem>>, vector<2x32xf32>
    tpu.vector_store %arg13[%c2, %c0_22], %69 {strides = array<i32>} : memref<16x32xf32, #tpu.memory_space<vmem>>, vector<2x32xf32>,
    %71 = vector.extract_strided_slice %10 {offsets = [4, 0], sizes = [2, 128], strides = [1, 1]} : vector<16x128xf32> to vector<2x128xf32>
    %cst_23 = arith.constant dense<0.000000e+00> : vector<2x128xf32>
    %72 = tpu.matmul %69, %3, %cst_23 {dimension_numbers = #tpu.dot_dimension_numbers<[1], [0], [0], [1], [0, 0, 1, 1], [], []>} : vector<2x32xf32>, vector<32x128xf32>, vector<2x128xf32> -> vector<2x128xf32>
    %73 = arith.addf %71, %72 : vector<2x128xf32>
    %74 = vector.extract_strided_slice %73 {offsets = [0, 0], sizes = [2, 32], strides = [1, 1]} : vector<2x128xf32> to vector<2x32xf32>
    %75 = arith.negf %74 : vector<2x32xf32>
    %76 = math.exp %75 : vector<2x32xf32>
    %cst_24 = arith.constant 1.000000e+00 : f32
    %77 = vector.broadcast %cst_24 : f32 to vector<2x32xf32>
    %78 = arith.addf %77, %76 : vector<2x32xf32>
    %79 = arith.divf %77, %78 : vector<2x32xf32>
    %80 = vector.extract_strided_slice %73 {offsets = [0, 32], sizes = [2, 32], strides = [1, 1]} : vector<2x128xf32> to vector<2x32xf32>
    %81 = arith.negf %80 : vector<2x32xf32>
    %82 = math.exp %81 : vector<2x32xf32>
    %cst_25 = arith.constant 1.000000e+00 : f32
    %83 = vector.broadcast %cst_25 : f32 to vector<2x32xf32>
    %84 = arith.addf %83, %82 : vector<2x32xf32>
    %85 = arith.divf %83, %84 : vector<2x32xf32>
    %86 = vector.extract_strided_slice %73 {offsets = [0, 64], sizes = [2, 32], strides = [1, 1]} : vector<2x128xf32> to vector<2x32xf32>
    %87 = math.tanh %86 : vector<2x32xf32>
    %88 = vector.extract_strided_slice %73 {offsets = [0, 96], sizes = [2, 32], strides = [1, 1]} : vector<2x128xf32> to vector<2x32xf32>
    %89 = arith.negf %88 : vector<2x32xf32>
    %90 = math.exp %89 : vector<2x32xf32>
    %cst_26 = arith.constant 1.000000e+00 : f32
    %91 = vector.broadcast %cst_26 : f32 to vector<2x32xf32>
    %92 = arith.addf %91, %90 : vector<2x32xf32>
    %93 = arith.divf %91, %92 : vector<2x32xf32>
    %94 = arith.mulf %85, %67 : vector<2x32xf32>
    %95 = arith.mulf %79, %87 : vector<2x32xf32>
    %96 = arith.addf %94, %95 : vector<2x32xf32>
    %97 = math.tanh %96 : vector<2x32xf32>
    %98 = arith.mulf %93, %97 : vector<2x32xf32>
    %c4 = arith.constant 4 : index
    %c0_27 = arith.constant 0 : index
    %99 = vector.load %arg13[%c4, %c0_27] : memref<16x32xf32, #tpu.memory_space<vmem>>, vector<2x32xf32>
    tpu.vector_store %arg13[%c4, %c0_27], %98 {strides = array<i32>} : memref<16x32xf32, #tpu.memory_space<vmem>>, vector<2x32xf32>,
    %100 = vector.extract_strided_slice %10 {offsets = [6, 0], sizes = [2, 128], strides = [1, 1]} : vector<16x128xf32> to vector<2x128xf32>
    %cst_28 = arith.constant dense<0.000000e+00> : vector<2x128xf32>
    %101 = tpu.matmul %98, %3, %cst_28 {dimension_numbers = #tpu.dot_dimension_numbers<[1], [0], [0], [1], [0, 0, 1, 1], [], []>} : vector<2x32xf32>, vector<32x128xf32>, vector<2x128xf32> -> vector<2x128xf32>
    %102 = arith.addf %100, %101 : vector<2x128xf32>
    %103 = vector.extract_strided_slice %102 {offsets = [0, 0], sizes = [2, 32], strides = [1, 1]} : vector<2x128xf32> to vector<2x32xf32>
    %104 = arith.negf %103 : vector<2x32xf32>
    %105 = math.exp %104 : vector<2x32xf32>
    %cst_29 = arith.constant 1.000000e+00 : f32
    %106 = vector.broadcast %cst_29 : f32 to vector<2x32xf32>
    %107 = arith.addf %106, %105 : vector<2x32xf32>
    %108 = arith.divf %106, %107 : vector<2x32xf32>
    %109 = vector.extract_strided_slice %102 {offsets = [0, 32], sizes = [2, 32], strides = [1, 1]} : vector<2x128xf32> to vector<2x32xf32>
    %110 = arith.negf %109 : vector<2x32xf32>
    %111 = math.exp %110 : vector<2x32xf32>
    %cst_30 = arith.constant 1.000000e+00 : f32
    %112 = vector.broadcast %cst_30 : f32 to vector<2x32xf32>
    %113 = arith.addf %112, %111 : vector<2x32xf32>
    %114 = arith.divf %112, %113 : vector<2x32xf32>
    %115 = vector.extract_strided_slice %102 {offsets = [0, 64], sizes = [2, 32], strides = [1, 1]} : vector<2x128xf32> to vector<2x32xf32>
    %116 = math.tanh %115 : vector<2x32xf32>
    %117 = vector.extract_strided_slice %102 {offsets = [0, 96], sizes = [2, 32], strides = [1, 1]} : vector<2x128xf32> to vector<2x32xf32>
    %118 = arith.negf %117 : vector<2x32xf32>
    %119 = math.exp %118 : vector<2x32xf32>
    %cst_31 = arith.constant 1.000000e+00 : f32
    %120 = vector.broadcast %cst_31 : f32 to vector<2x32xf32>
    %121 = arith.addf %120, %119 : vector<2x32xf32>
    %122 = arith.divf %120, %121 : vector<2x32xf32>
    %123 = arith.mulf %114, %96 : vector<2x32xf32>
    %124 = arith.mulf %108, %116 : vector<2x32xf32>
    %125 = arith.addf %123, %124 : vector<2x32xf32>
    %126 = math.tanh %125 : vector<2x32xf32>
    %127 = arith.mulf %122, %126 : vector<2x32xf32>
    %c6 = arith.constant 6 : index
    %c0_32 = arith.constant 0 : index
    %128 = vector.load %arg13[%c6, %c0_32] : memref<16x32xf32, #tpu.memory_space<vmem>>, vector<2x32xf32>
    tpu.vector_store %arg13[%c6, %c0_32], %127 {strides = array<i32>} : memref<16x32xf32, #tpu.memory_space<vmem>>, vector<2x32xf32>,
    %129 = vector.extract_strided_slice %10 {offsets = [8, 0], sizes = [2, 128], strides = [1, 1]} : vector<16x128xf32> to vector<2x128xf32>
    %cst_33 = arith.constant dense<0.000000e+00> : vector<2x128xf32>
    %130 = tpu.matmul %127, %3, %cst_33 {dimension_numbers = #tpu.dot_dimension_numbers<[1], [0], [0], [1], [0, 0, 1, 1], [], []>} : vector<2x32xf32>, vector<32x128xf32>, vector<2x128xf32> -> vector<2x128xf32>
    %131 = arith.addf %129, %130 : vector<2x128xf32>
    %132 = vector.extract_strided_slice %131 {offsets = [0, 0], sizes = [2, 32], strides = [1, 1]} : vector<2x128xf32> to vector<2x32xf32>
    %133 = arith.negf %132 : vector<2x32xf32>
    %134 = math.exp %133 : vector<2x32xf32>
    %cst_34 = arith.constant 1.000000e+00 : f32
    %135 = vector.broadcast %cst_34 : f32 to vector<2x32xf32>
    %136 = arith.addf %135, %134 : vector<2x32xf32>
    %137 = arith.divf %135, %136 : vector<2x32xf32>
    %138 = vector.extract_strided_slice %131 {offsets = [0, 32], sizes = [2, 32], strides = [1, 1]} : vector<2x128xf32> to vector<2x32xf32>
    %139 = arith.negf %138 : vector<2x32xf32>
    %140 = math.exp %139 : vector<2x32xf32>
    %cst_35 = arith.constant 1.000000e+00 : f32
    %141 = vector.broadcast %cst_35 : f32 to vector<2x32xf32>
    %142 = arith.addf %141, %140 : vector<2x32xf32>
    %143 = arith.divf %141, %142 : vector<2x32xf32>
    %144 = vector.extract_strided_slice %131 {offsets = [0, 64], sizes = [2, 32], strides = [1, 1]} : vector<2x128xf32> to vector<2x32xf32>
    %145 = math.tanh %144 : vector<2x32xf32>
    %146 = vector.extract_strided_slice %131 {offsets = [0, 96], sizes = [2, 32], strides = [1, 1]} : vector<2x128xf32> to vector<2x32xf32>
    %147 = arith.negf %146 : vector<2x32xf32>
    %148 = math.exp %147 : vector<2x32xf32>
    %cst_36 = arith.constant 1.000000e+00 : f32
    %149 = vector.broadcast %cst_36 : f32 to vector<2x32xf32>
    %150 = arith.addf %149, %148 : vector<2x32xf32>
    %151 = arith.divf %149, %150 : vector<2x32xf32>
    %152 = arith.mulf %143, %125 : vector<2x32xf32>
    %153 = arith.mulf %137, %145 : vector<2x32xf32>
    %154 = arith.addf %152, %153 : vector<2x32xf32>
    %155 = math.tanh %154 : vector<2x32xf32>
    %156 = arith.mulf %151, %155 : vector<2x32xf32>
    %c8 = arith.constant 8 : index
    %c0_37 = arith.constant 0 : index
    %157 = vector.load %arg13[%c8, %c0_37] : memref<16x32xf32, #tpu.memory_space<vmem>>, vector<2x32xf32>
    tpu.vector_store %arg13[%c8, %c0_37], %156 {strides = array<i32>} : memref<16x32xf32, #tpu.memory_space<vmem>>, vector<2x32xf32>,
    %158 = vector.extract_strided_slice %10 {offsets = [10, 0], sizes = [2, 128], strides = [1, 1]} : vector<16x128xf32> to vector<2x128xf32>
    %cst_38 = arith.constant dense<0.000000e+00> : vector<2x128xf32>
    %159 = tpu.matmul %156, %3, %cst_38 {dimension_numbers = #tpu.dot_dimension_numbers<[1], [0], [0], [1], [0, 0, 1, 1], [], []>} : vector<2x32xf32>, vector<32x128xf32>, vector<2x128xf32> -> vector<2x128xf32>
    %160 = arith.addf %158, %159 : vector<2x128xf32>
    %161 = vector.extract_strided_slice %160 {offsets = [0, 0], sizes = [2, 32], strides = [1, 1]} : vector<2x128xf32> to vector<2x32xf32>
    %162 = arith.negf %161 : vector<2x32xf32>
    %163 = math.exp %162 : vector<2x32xf32>
    %cst_39 = arith.constant 1.000000e+00 : f32
    %164 = vector.broadcast %cst_39 : f32 to vector<2x32xf32>
    %165 = arith.addf %164, %163 : vector<2x32xf32>
    %166 = arith.divf %164, %165 : vector<2x32xf32>
    %167 = vector.extract_strided_slice %160 {offsets = [0, 32], sizes = [2, 32], strides = [1, 1]} : vector<2x128xf32> to vector<2x32xf32>
    %168 = arith.negf %167 : vector<2x32xf32>
    %169 = math.exp %168 : vector<2x32xf32>
    %cst_40 = arith.constant 1.000000e+00 : f32
    %170 = vector.broadcast %cst_40 : f32 to vector<2x32xf32>
    %171 = arith.addf %170, %169 : vector<2x32xf32>
    %172 = arith.divf %170, %171 : vector<2x32xf32>
    %173 = vector.extract_strided_slice %160 {offsets = [0, 64], sizes = [2, 32], strides = [1, 1]} : vector<2x128xf32> to vector<2x32xf32>
    %174 = math.tanh %173 : vector<2x32xf32>
    %175 = vector.extract_strided_slice %160 {offsets = [0, 96], sizes = [2, 32], strides = [1, 1]} : vector<2x128xf32> to vector<2x32xf32>
    %176 = arith.negf %175 : vector<2x32xf32>
    %177 = math.exp %176 : vector<2x32xf32>
    %cst_41 = arith.constant 1.000000e+00 : f32
    %178 = vector.broadcast %cst_41 : f32 to vector<2x32xf32>
    %179 = arith.addf %178, %177 : vector<2x32xf32>
    %180 = arith.divf %178, %179 : vector<2x32xf32>
    %181 = arith.mulf %172, %154 : vector<2x32xf32>
    %182 = arith.mulf %166, %174 : vector<2x32xf32>
    %183 = arith.addf %181, %182 : vector<2x32xf32>
    %184 = math.tanh %183 : vector<2x32xf32>
    %185 = arith.mulf %180, %184 : vector<2x32xf32>
    %c10 = arith.constant 10 : index
    %c0_42 = arith.constant 0 : index
    %186 = vector.load %arg13[%c10, %c0_42] : memref<16x32xf32, #tpu.memory_space<vmem>>, vector<2x32xf32>
    tpu.vector_store %arg13[%c10, %c0_42], %185 {strides = array<i32>} : memref<16x32xf32, #tpu.memory_space<vmem>>, vector<2x32xf32>,
    %187 = vector.extract_strided_slice %10 {offsets = [12, 0], sizes = [2, 128], strides = [1, 1]} : vector<16x128xf32> to vector<2x128xf32>
    %cst_43 = arith.constant dense<0.000000e+00> : vector<2x128xf32>
    %188 = tpu.matmul %185, %3, %cst_43 {dimension_numbers = #tpu.dot_dimension_numbers<[1], [0], [0], [1], [0, 0, 1, 1], [], []>} : vector<2x32xf32>, vector<32x128xf32>, vector<2x128xf32> -> vector<2x128xf32>
    %189 = arith.addf %187, %188 : vector<2x128xf32>
    %190 = vector.extract_strided_slice %189 {offsets = [0, 0], sizes = [2, 32], strides = [1, 1]} : vector<2x128xf32> to vector<2x32xf32>
    %191 = arith.negf %190 : vector<2x32xf32>
    %192 = math.exp %191 : vector<2x32xf32>
    %cst_44 = arith.constant 1.000000e+00 : f32
    %193 = vector.broadcast %cst_44 : f32 to vector<2x32xf32>
    %194 = arith.addf %193, %192 : vector<2x32xf32>
    %195 = arith.divf %193, %194 : vector<2x32xf32>
    %196 = vector.extract_strided_slice %189 {offsets = [0, 32], sizes = [2, 32], strides = [1, 1]} : vector<2x128xf32> to vector<2x32xf32>
    %197 = arith.negf %196 : vector<2x32xf32>
    %198 = math.exp %197 : vector<2x32xf32>
    %cst_45 = arith.constant 1.000000e+00 : f32
    %199 = vector.broadcast %cst_45 : f32 to vector<2x32xf32>
    %200 = arith.addf %199, %198 : vector<2x32xf32>
    %201 = arith.divf %199, %200 : vector<2x32xf32>
    %202 = vector.extract_strided_slice %189 {offsets = [0, 64], sizes = [2, 32], strides = [1, 1]} : vector<2x128xf32> to vector<2x32xf32>
    %203 = math.tanh %202 : vector<2x32xf32>
    %204 = vector.extract_strided_slice %189 {offsets = [0, 96], sizes = [2, 32], strides = [1, 1]} : vector<2x128xf32> to vector<2x32xf32>
    %205 = arith.negf %204 : vector<2x32xf32>
    %206 = math.exp %205 : vector<2x32xf32>
    %cst_46 = arith.constant 1.000000e+00 : f32
    %207 = vector.broadcast %cst_46 : f32 to vector<2x32xf32>
    %208 = arith.addf %207, %206 : vector<2x32xf32>
    %209 = arith.divf %207, %208 : vector<2x32xf32>
    %210 = arith.mulf %201, %183 : vector<2x32xf32>
    %211 = arith.mulf %195, %203 : vector<2x32xf32>
    %212 = arith.addf %210, %211 : vector<2x32xf32>
    %213 = math.tanh %212 : vector<2x32xf32>
    %214 = arith.mulf %209, %213 : vector<2x32xf32>
    %c12 = arith.constant 12 : index
    %c0_47 = arith.constant 0 : index
    %215 = vector.load %arg13[%c12, %c0_47] : memref<16x32xf32, #tpu.memory_space<vmem>>, vector<2x32xf32>
    tpu.vector_store %arg13[%c12, %c0_47], %214 {strides = array<i32>} : memref<16x32xf32, #tpu.memory_space<vmem>>, vector<2x32xf32>,
    %216 = vector.extract_strided_slice %10 {offsets = [14, 0], sizes = [2, 128], strides = [1, 1]} : vector<16x128xf32> to vector<2x128xf32>
    %cst_48 = arith.constant dense<0.000000e+00> : vector<2x128xf32>
    %217 = tpu.matmul %214, %3, %cst_48 {dimension_numbers = #tpu.dot_dimension_numbers<[1], [0], [0], [1], [0, 0, 1, 1], [], []>} : vector<2x32xf32>, vector<32x128xf32>, vector<2x128xf32> -> vector<2x128xf32>
    %218 = arith.addf %216, %217 : vector<2x128xf32>
    %219 = vector.extract_strided_slice %218 {offsets = [0, 0], sizes = [2, 32], strides = [1, 1]} : vector<2x128xf32> to vector<2x32xf32>
    %220 = arith.negf %219 : vector<2x32xf32>
    %221 = math.exp %220 : vector<2x32xf32>
    %cst_49 = arith.constant 1.000000e+00 : f32
    %222 = vector.broadcast %cst_49 : f32 to vector<2x32xf32>
    %223 = arith.addf %222, %221 : vector<2x32xf32>
    %224 = arith.divf %222, %223 : vector<2x32xf32>
    %225 = vector.extract_strided_slice %218 {offsets = [0, 32], sizes = [2, 32], strides = [1, 1]} : vector<2x128xf32> to vector<2x32xf32>
    %226 = arith.negf %225 : vector<2x32xf32>
    %227 = math.exp %226 : vector<2x32xf32>
    %cst_50 = arith.constant 1.000000e+00 : f32
    %228 = vector.broadcast %cst_50 : f32 to vector<2x32xf32>
    %229 = arith.addf %228, %227 : vector<2x32xf32>
    %230 = arith.divf %228, %229 : vector<2x32xf32>
    %231 = vector.extract_strided_slice %218 {offsets = [0, 64], sizes = [2, 32], strides = [1, 1]} : vector<2x128xf32> to vector<2x32xf32>
    %232 = math.tanh %231 : vector<2x32xf32>
    %233 = vector.extract_strided_slice %218 {offsets = [0, 96], sizes = [2, 32], strides = [1, 1]} : vector<2x128xf32> to vector<2x32xf32>
    %234 = arith.negf %233 : vector<2x32xf32>
    %235 = math.exp %234 : vector<2x32xf32>
    %cst_51 = arith.constant 1.000000e+00 : f32
    %236 = vector.broadcast %cst_51 : f32 to vector<2x32xf32>
    %237 = arith.addf %236, %235 : vector<2x32xf32>
    %238 = arith.divf %236, %237 : vector<2x32xf32>
    %239 = arith.mulf %230, %212 : vector<2x32xf32>
    %240 = arith.mulf %224, %232 : vector<2x32xf32>
    %241 = arith.addf %239, %240 : vector<2x32xf32>
    %242 = math.tanh %241 : vector<2x32xf32>
    %243 = arith.mulf %238, %242 : vector<2x32xf32>
    %c14 = arith.constant 14 : index
    %c0_52 = arith.constant 0 : index
    %244 = vector.load %arg13[%c14, %c0_52] : memref<16x32xf32, #tpu.memory_space<vmem>>, vector<2x32xf32>
    tpu.vector_store %arg13[%c14, %c0_52], %243 {strides = array<i32>} : memref<16x32xf32, #tpu.memory_space<vmem>>, vector<2x32xf32>,
    %c0_53 = arith.constant 0 : index
    %c0_54 = arith.constant 0 : index
    %245 = vector.load %arg11[%c0_53, %c0_54] : memref<2x32xf32, #tpu.memory_space<vmem>>, vector<2x32xf32>
    tpu.vector_store %arg11[%c0_53, %c0_54], %243 {strides = array<i32>} : memref<2x32xf32, #tpu.memory_space<vmem>>, vector<2x32xf32>,
    %c0_55 = arith.constant 0 : index
    %c0_56 = arith.constant 0 : index
    %246 = vector.load %arg12[%c0_55, %c0_56] : memref<2x32xf32, #tpu.memory_space<vmem>>, vector<2x32xf32>
    tpu.vector_store %arg12[%c0_55, %c0_56], %241 {strides = array<i32>} : memref<2x32xf32, #tpu.memory_space<vmem>>, vector<2x32xf32>,
    %c0_57 = arith.constant 0 : index
    %c0_58 = arith.constant 0 : index
    %247 = vector.load %arg13[%c0_57, %c0_58] : memref<16x32xf32, #tpu.memory_space<vmem>>, vector<16x32xf32>
    %c0_59 = arith.constant 0 : index
    %c0_60 = arith.constant 0 : index
    %248 = vector.load %arg5[%c0_59, %c0_60] : memref<32x128xf32, #tpu.memory_space<vmem>>, vector<32x128xf32>
    %cst_61 = arith.constant dense<0.000000e+00> : vector<16x128xf32>
    %249 = tpu.matmul %247, %248, %cst_61 {dimension_numbers = #tpu.dot_dimension_numbers<[1], [0], [0], [1], [0, 0, 1, 1], [], []>} : vector<16x32xf32>, vector<32x128xf32>, vector<16x128xf32> -> vector<16x128xf32>
    %c0_62 = arith.constant 0 : index
    %c0_63 = arith.constant 0 : index
    %250 = vector.load %arg6[%c0_62, %c0_63] : memref<1x128xf32, #tpu.memory_space<vmem>>, vector<1x128xf32>
    %251 = vector.shape_cast %250 : vector<1x128xf32> to vector<1x128xf32>
    %252 = vector.broadcast %251 : vector<1x128xf32> to vector<16x128xf32>
    %253 = arith.addf %249, %252 : vector<16x128xf32>
    %c0_64 = arith.constant 0 : index
    %c0_65 = arith.constant 0 : index
    %254 = vector.load %arg9[%c0_64, %c0_65] : memref<16x128xf32, #tpu.memory_space<vmem>>, vector<16x128xf32>
    tpu.vector_store %arg9[%c0_64, %c0_65], %253 {strides = array<i32>} : memref<16x128xf32, #tpu.memory_space<vmem>>, vector<16x128xf32>,
    %c0_66 = arith.constant 0 : index
    %c0_67 = arith.constant 0 : index
    %255 = vector.load %arg7[%c0_66, %c0_67] : memref<32x128xf32, #tpu.memory_space<vmem>>, vector<32x128xf32>
    %cst_68 = arith.constant dense<0.000000e+00> : vector<16x128xf32>
    %256 = tpu.matmul %247, %255, %cst_68 {dimension_numbers = #tpu.dot_dimension_numbers<[1], [0], [0], [1], [0, 0, 1, 1], [], []>} : vector<16x32xf32>, vector<32x128xf32>, vector<16x128xf32> -> vector<16x128xf32>
    %c0_69 = arith.constant 0 : index
    %c0_70 = arith.constant 0 : index
    %257 = vector.load %arg8[%c0_69, %c0_70] : memref<1x128xf32, #tpu.memory_space<vmem>>, vector<1x128xf32>
    %258 = vector.shape_cast %257 : vector<1x128xf32> to vector<1x128xf32>
    %259 = vector.broadcast %258 : vector<1x128xf32> to vector<16x128xf32>
    %260 = arith.addf %256, %259 : vector<16x128xf32>
    %c0_71 = arith.constant 0 : index
    %c0_72 = arith.constant 0 : index
    %261 = vector.load %arg10[%c0_71, %c0_72] : memref<16x128xf32, #tpu.memory_space<vmem>>, vector<16x128xf32>
    tpu.vector_store %arg10[%c0_71, %c0_72], %260 {strides = array<i32>} : memref<16x128xf32, #tpu.memory_space<vmem>>, vector<16x128xf32>,
    return
  }
  func.func @transform_0(%arg0: i32) -> (i32, i32) {
    %c0_i32 = arith.constant 0 : i32
    %c0_i32_0 = arith.constant 0 : i32
    return %arg0, %c0_i32 : i32, i32
  }
  func.func @transform_1(%arg0: i32) -> (i32, i32) {
    %c0_i32 = arith.constant 0 : i32
    %c0_i32_0 = arith.constant 0 : i32
    %c0_i32_1 = arith.constant 0 : i32
    return %c0_i32, %c0_i32_0 : i32, i32
  }
  func.func @transform_2(%arg0: i32) -> (i32, i32) {
    %c0_i32 = arith.constant 0 : i32
    %c0_i32_0 = arith.constant 0 : i32
    %c0_i32_1 = arith.constant 0 : i32
    return %c0_i32, %c0_i32_0 : i32, i32
  }
  func.func @transform_3(%arg0: i32) -> (i32, i32) {
    %c0_i32 = arith.constant 0 : i32
    %c0_i32_0 = arith.constant 0 : i32
    %c0_i32_1 = arith.constant 0 : i32
    return %c0_i32, %c0_i32_0 : i32, i32
  }
  func.func @transform_4(%arg0: i32) -> (i32, i32) {
    %c0_i32 = arith.constant 0 : i32
    %c0_i32_0 = arith.constant 0 : i32
    %c0_i32_1 = arith.constant 0 : i32
    return %c0_i32, %c0_i32_0 : i32, i32
  }
  func.func @transform_5(%arg0: i32) -> (i32, i32) {
    %c0_i32 = arith.constant 0 : i32
    %c0_i32_0 = arith.constant 0 : i32
    %c0_i32_1 = arith.constant 0 : i32
    return %c0_i32, %c0_i32_0 : i32, i32
  }
  func.func @transform_6(%arg0: i32) -> (i32, i32) {
    %c0_i32 = arith.constant 0 : i32
    %c0_i32_0 = arith.constant 0 : i32
    %c0_i32_1 = arith.constant 0 : i32
    return %c0_i32, %c0_i32_0 : i32, i32
  }
  func.func @transform_7(%arg0: i32) -> (i32, i32) {
    %c0_i32 = arith.constant 0 : i32
    %c0_i32_0 = arith.constant 0 : i32
    %c0_i32_1 = arith.constant 0 : i32
    return %c0_i32, %c0_i32_0 : i32, i32
  }
  func.func @transform_8(%arg0: i32) -> (i32, i32) {
    %c0_i32 = arith.constant 0 : i32
    %c0_i32_0 = arith.constant 0 : i32
    return %arg0, %c0_i32 : i32, i32
  }
  func.func @transform_9(%arg0: i32) -> (i32, i32) {
    %c0_i32 = arith.constant 0 : i32
    %c0_i32_0 = arith.constant 0 : i32
    return %arg0, %c0_i32 : i32, i32
  }
}

</mosaic_0001>

<bundles_post_ra>
// kernel: tpu_custom_call.1
= control target key start
LH: loop header
LB: loop body
LE: loop exit
PB: predicated region body
PF: predicated region fallthrough
CT: control target
= control target key end

     0   :  { %s2674_s0 = inlined_call_operand.vmem [shape: f32[32,16], index: 0, kind: input, shape index: {}]   ;;  %s2675_s1 = inlined_call_operand.vmem [shape: f32[16,128], index: 1, kind: input, shape index: {}]   ;;  %s2676_s2 = inlined_call_operand.vmem [shape: f32[32,128], index: 2, kind: input, shape index: {}]   ;;  %s2677_s3 = inlined_call_operand.vmem [shape: f32[1,128], index: 3, kind: input, shape index: {}]   ;;  %s2678_s4 = inlined_call_operand.hbm [shape: f32[32,128], index: 4, kind: input, shape index: {}]   ;;  %s2679_s5 = inlined_call_operand.vmem [shape: f32[1,128], index: 5, kind: input, shape index: {}]   ;;  %s2680_s6 = inlined_call_operand.hbm [shape: f32[32,128], index: 6, kind: input, shape index: {}]   ;;  %s2681_s7 = inlined_call_operand.vmem [shape: f32[1,128], index: 7, kind: input, shape index: {}]   ;;  %s2682_s8 = inlined_call_operand.hbm [shape: f32[32,128], index: 8, kind: output, shape index: {0}]   ;;  %s2683_s9 = inlined_call_operand.hbm [shape: f32[32,128], index: 9, kind: output, shape index: {1}]  }
   0x1   :  { %2685 = sst [smem:[#allocation17_spill]] %s2674_s0 }
   0x2   :  { %2686 = sst [smem:[#allocation18_spill]] %s2675_s1 }
   0x3   :  { %15 = vsyncpa [#allocation6], 0 }
   0x4   :  { %16 = vsyncpa [#allocation9], 0 }
   0x5   :  { %17 = vsyncpa [#allocation7], 0 }
   0x6   :  { %19 = vsyncpa [#allocation7 + $0x1], 0 }
   0x7   :  { %20 = vsyncpa [#allocation12], 0 }
   0x8   :  { %22 = vsyncpa [#allocation12 + $0x1], 0  ;;  %s2279_s30 = smov 0   ;;  %s2281_s10 = smov 0  }
   0x9   :  { %s2283_s11 = smov 0   ;;  %s2285_s12 = smov 0  }
   0xa LB: > { %s2300_s13 = sadd.s32 4294967295, %s2213_s12   ;;  %s1703_s14 = sadd.s32 4294967294, %s2213_s12   ;;  %s2213_s12 = sphi %s2285_s12, %s2702_s12   ;;  %s2209_s11 = sphi %s2283_s11, %s2701_s11   ;;  %s2205_s10 = sphi %s2281_s10, %s2700_s10   ;;  %s2201_s30 = sphi %s2279_s30, %s2699_s30  }
   0xb   : > { %s2304_s15 = sadd.s32 1, %s2213_s12   ;;  %s208_s16 = sadd.s32 1, %s2209_s11 }
   0xc   : > { %s205_s17 = ssub.s32 %s2213_s12, %s2304_s15  ;;  %p218_p0 = scmp.ne.s32.totalorder %s2209_s11, %s2205_s10 }
   0xd   : > { %p206_p1 = scmp.eq.s32.totalorder %s205_s17, 0  ;;  %p219_p2 = scmp.eq.s32.totalorder %s2300_s13, 1 }
   0xe   : > { %p224_p3 = scmp.ne.s32.totalorder %s2205_s10, %s2201_s30  ;;  %p225_p4 = scmp.eq.s32.totalorder %s1703_s14, 1 }
   0xf   : > { %s2315_s18 = scalar_select %p206_p1, %s2209_s11, %s208_s16  }
  0x10   : > { %p2317_p5 = por %p219_p2, %p218_p0  ;;  %p2321_p6 = por %p225_p4, %p224_p3 }
  0x11   : > { %p1704_p7 = scmp.ge.s32.totalorder %s2213_s12, 1  ;;  %p258_p8 = scmp.lt.s32.totalorder %s2213_s12, 3 }
  0x12   : > { %s2688_s20 = scalar_select %p2321_p6, 1, 0 }
  0x13   : > { %p2684_p10 = scmp.eq.s32.totalorder %s2300_s13, 0  ;;  %p2329_p11 = pnand %p1704_p7, %p258_p8 }
  0x14   : > { %s2215_s22 = smov [#allocation5]   ;;  %s2216_s25 = smov [#allocation8]  }
  0x15   : > { %s279_s23 = sshll.u32 %s2215_s22, 4  ;;  %p1936_p12 = pneg %p2329_p11  ;;  %s280_s23 = int_to_ptr.vmem [resolvable:$true] %s279_s23 }
  0x16   : > { %s295_s26 = sshll.u32 %s2216_s25, 4  ;;  %s2074_s27 = scalar_lea.vmem %s280_s23, 512  ;;  %s296_s26 = int_to_ptr.vmem [resolvable:$true] %s295_s26 }
  0x17   : > { %p2337_p13 = pnand %p2684_p10, %p1936_p12  ;;  %p2075_p1 = scmp.ne.s32.totalorder %s280_s23, %s2074_s27 }
  0x18   : > { %p2082_p4 = scmp.lt.s32.totalorder %s280_s23, %s280_s23  ;;  %p2083_p7 = scmp.lt.s32.totalorder %s2074_s27, %s2074_s27 }
  0x19   : > { %p2065_p0 = pneg %p2337_p13 }
  0x1a   : > { %p2084_p8 = por %p2083_p7, %p2082_p4 }
  0x1b   : > { %p2077_p2 = pnand %p2075_p1, %p2065_p0 }
  0x1d   : > { %p2078_p3 = pneg %p2077_p2 }
  0x1f   : > { %p2085_p12 = pnand %p2084_p8, %p2078_p3 }
  0x21   : > { %2088 = shalt.err (!%p2085_p12)
}
  0x22   : > { %s2217_s28 = smov 128   ;;  %s2218_s29 = smov 8  }
  0x23   : > { %1939 = dma.hbm_to_vmem [thread:$0]  (!%p2337_p13), %s2678_s4, 512, %s280_s23, [#allocation6], %s2217_s28, %s2217_s28, %s2218_s29  }
  0x24   : > { %s2100_s17 = scalar_lea.vmem %s296_s26, 512  ;;  %p2108_p10 = scmp.lt.s32.totalorder %s296_s26, %s296_s26 }
  0x25   : > { %p2101_p9 = scmp.ne.s32.totalorder %s296_s26, %s2100_s17  ;;  %p2109_p6 = scmp.lt.s32.totalorder %s2100_s17, %s2100_s17 }
  0x27   : > { %p2103_p1 = pnand %p2101_p9, %p2065_p0  ;;  %p2110_p4 = por %p2109_p6, %p2108_p10 }
  0x29   : > { %p2104_p2 = pneg %p2103_p1 }
  0x2b   : > { %p2111_p3 = pnand %p2110_p4, %p2104_p2 }
  0x2d   : > { %2114 = shalt.err (!%p2111_p3)
}
  0x2e   : > { %1942 = dma.hbm_to_vmem [thread:$0]  (!%p2337_p13), %s2680_s6, 512, %s296_s26, [#allocation9], %s2217_s28, %s2217_s28, %s2218_s29  }
  0x2f   : > { %323 = sbr.rel (%p2329_p11) target bundleno = 5859 (0x16e3), region = 52  ;;  %p2691_p7 = scmp.eq.s32.totalorder (!%p2329_p11), %s2300_s13, 0 }
  0x34   : > { %2184 = dma.done.wait (%p2691_p7), [#allocation6], 512   ;;  %p2692_p9 = pmov %p2691_p7 }
  0x35   : > { %p2693_p0 = pmov %p2691_p7 }
  0x36   : > { %2186 = vsyncadd (%p2692_p9), [#allocation6], 4294966784 }
  0x37   : > { %2188 = dma.done.wait (%p2693_p0), [#allocation9], 512   ;;  %p2694_p6 = pmov %p2693_p0 }
  0x38   : > { %s2370_s23 = sand.u32 1, %s2205_s10   ;;  %s1713_s24 = sshll.u32 %s2300_s13, 1 }
  0x39   : > { %2190 = vsyncadd (%p2694_p6), [#allocation9], 4294966784  ;;  %s1711_s21 = sshll.u32 %s2370_s23, 4  ;;  %p369_p10 = scmp.lt.s32.totalorder %s1713_s24, 3 }
  0x3a   : > { %s2695_s0 = sld [smem:[#allocation17_spill]]  ;;  %s2377_s14 = scalar_lea.vmem [#allocation10], %s1711_s21 }
  0x3b   : > { %s2704_s24 = smov (!%p369_p10, %s1713_s24), 3  ;;  %s2379_s16 = scalar_lea.vmem [#allocation11], %s1711_s21 }
  0x3c   : > { %s1714_s26 = sshll.u32 %s2704_s24, 3  ;;  %p2696_p11 = scmp.ne.s32.totalorder %s2300_s13, 0 }
  0x3e   : > { %379 = sbr.rel (%p2696_p11) target bundleno = 69 (0x45), region = 64 }
  0x40   : > { %s372_s29 = scalar_lea.vmem %s2695_s0, %s1714_s26 }
  0x43   : > { %vm380_vm0 = vcmask 254976   ;;  %v2219_v0 = vmov 0.0  }
  0x44   : > { %381 = vst.msk [vmem:[#allocation2] sm:$0x3] %vm380_vm0, %v2219_v0  ;;  %382 = vst.msk [vmem:[#allocation3] sm:$0x3] %vm380_vm0, %v2219_v0 }
  0x45 PF: > { %s2697_s1 = sld [smem:[#allocation18_spill]]  ;;  %v2389_v2 = vld [vmem:[%s2676_s2 + $0x18] sm:$0xff]  ;;  %v2220_v4 = vmov 0.0   ;;  %v387_v5 = vld [vmem:[%s372_s29] sm:$0xff]  ;;  %vm398_vm1 = vcmask 130048   ;;  %v2399_v6 = vld [vmem:[%s2676_s2 + $0x10] sm:$0xff] }
  0x46   : > { %1814 = vmatprep.subr.mxu1 %v2220_v4  ;;  %v388_v7 = vld [vmem:[%s372_s29 + $0x8] sm:$0xff]  ;;  %1811 = vmatprep.mubr.msk.f32.mxu0 %vm398_vm1, %v387_v5  ;;  %v2412_v9 = vld [vmem:[%s2676_s2] sm:$0xff]  ;;  %vm2221_vm2 = vmmov 0   ;;  %vm482_vm3 = vcmask 261120   ;;  %s2222_s21 = smov 64   ;;  %s2223_s27 = smov 32  }
  0x47   : > { %1815 = vmatpush3.msra.mxu1 %v2389_v2  ;;  %v2405_v8 = vld [vmem:[%s2676_s2 + $0x8] sm:$0xff]  ;;  %1822 = vmatprep.mubr.msk.f32.mxu1 %vm2221_vm2, %v2220_v4  ;;  %v1716_v11 = vld [vmem:[%s2677_s3] ss:$0 sm:$0xff]  ;;  %vm589_vm4 = vcmask 254976   ;;  %vm698_vm5 = vcmask 257026   ;;  %s2224_s28 = smov 96  }
  0x48   : > { %1816 = vmatprep.subr.mxu1 %v2220_v4  ;;  %vm922_vm6 = vcmask 261126   ;;  %vm810_vm7 = vcmask 259076   ;;  %s1749_s29 = sshll.u32 %s2300_s13, 8  ;;  %s1571_s26 = sshll.u32 %s2377_s14, 4  ;;  %s2594_s26 = int_to_ptr.vmem [resolvable:$true] %s1571_s26 }
  0x49   : > { %1817 = vmatpush3.msra.mxu1 %v2399_v6  ;;  %s1587_s17 = sshll.u32 %s2379_s16, 4  ;;  %s2601_s25 = scalar_lea.hbm %s2683_s9, %s1749_s29  ;;  %s2603_s17 = int_to_ptr.vmem [resolvable:$true] %s1587_s17 }
  0x4a   : > { %1818 = vmatprep.subr.mxu1 %v2220_v4  ;;  %s1553_s24 = scalar_lea.sflag [#allocation7], %s2370_s23 }
  0x4b   : > { %v390_v1 = vld [vmem:[%s2697_s1 + $0x8] sm:$0xff]  ;;  %v389_v3 = vld [vmem:[%s2697_s1] sm:$0xff]  ;;  %1819 = vmatpush3.msra.mxu1 %v2405_v8 }
  0x4c   : > { %1807 = vmatprep.subr.mxu0 %v390_v1  ;;  %v480_v10 = vld [vmem:[#allocation2] sm:$0x3]  ;;  %1820 = vmatprep.subr.mxu1 %v2220_v4  ;;  %v481_v20 = vld [vmem:[#allocation3] sm:$0x3] }
  0x4d   : > { %1808 = vmatpush3.msra.mxu0 %v390_v1  ;;  %1821 = vmatpush3.msra.mxu1 %v2412_v9 }
  0x4e   : > { %1809 = vmatprep.subr.mxu0 %v389_v3  ;;  %1823 = vmatmul.mubr.msk.f32.vlgmr.msra.gmra.mxu1 %vm482_vm3, %v480_v10 }
  0x4f   : > { %1810 = vmatpush3.msra.mxu0 %v389_v3  ;;  %1836 = vmatprep.subr.mxu1 %v2220_v4 }
  0x50   : > { %1812 = vmatmul.mubr.msk.f32.vlgmr.msra.gmra.mxu0 %vm398_vm1, %v388_v7  ;;  %1825 = vmatprep.subr.mxu0 %v2220_v4 }
  0x51   : > { %1826 = vmatpush3.msra.mxu0 %v2389_v2  ;;  %1833 = vmatprep.mubr.msk.f32.mxu0 %vm2221_vm2, %v2220_v4 }
  0x52   : > { %1827 = vmatprep.subr.mxu0 %v2220_v4  ;;  %1837 = vmatpush3.msra.mxu1 %v2389_v2 }
  0x53   : > { %1828 = vmatpush3.msra.mxu0 %v2399_v6  ;;  %1838 = vmatprep.subr.mxu1 %v2220_v4 }
  0x54   : > { %1829 = vmatprep.subr.mxu0 %v2220_v4  ;;  %1839 = vmatpush3.msra.mxu1 %v2399_v6 }
  0x55   : > { %1830 = vmatpush3.msra.mxu0 %v2405_v8  ;;  %1844 = vmatprep.mubr.msk.f32.mxu1 %vm2221_vm2, %v2220_v4 }
  0x56   : > { %1831 = vmatprep.subr.mxu0 %v2220_v4  ;;  %1840 = vmatprep.subr.mxu1 %v2220_v4 }
  0x57   : > { %1832 = vmatpush3.msra.mxu0 %v2412_v9  ;;  %1841 = vmatpush3.msra.mxu1 %v2405_v8 }
  0x58   : > { %1847 = vmatprep.subr.mxu0 %v2220_v4  ;;  %1842 = vmatprep.subr.mxu1 %v2220_v4 }
  0x59   : > { %1843 = vmatpush3.msra.mxu1 %v2412_v9 }
  0x5a   : > { %1858 = vmatprep.subr.mxu1 %v2220_v4 }
 0x10e   : > { %v552_v16 = vpop.f32.mrf.mxu1 }
 0x110   : > { %v1813_v12 = vpop.f32.mrf.mxu0  ;;  %v1824_v18 = vpop.f32.mrf.mxu1 }
 0x111   : > { %v2445_v13 = vadd.f32 %v1813_v12, %v1716_v11 }
 0x112   : > { %v471_v14 = vpop.f32.mrf.mxu0 }
 0x113   : > { %v2447_v15 = vadd.f32 %v1716_v11, %v471_v14 }
 0x115   : > { %v556_v17 = vadd.f32 %v552_v16, %v2447_v15 }
 0x117   : > { %1999 = vtanh.f32 %v556_v17  ;;  %v1720_v21 = vmul.f32 -1.442695, %v556_v17 }
 0x119   : > { %2001 = vpow2.f32 %v1720_v21 }
 0x124   : > { %v2000_v19 = vpop.eup %1999 }
 0x125   : > { %570 = vrot.lane.b32.xlu0 %v2000_v19, %s2222_s21 }
 0x126   : > { %v2002_v22 = vpop.eup %2001 }
 0x127   : > { %v560_v23 = vadd.f32 1.0, %v2002_v22 }
 0x129   : > { %565 = vrot.lane.b32.xlu0 %v481_v20, %s2223_s27  ;;  %2003 = vrcp.f32 %v560_v23 }
 0x136   : > { %v2004_v24 = vpop.eup %2003 }
 0x197   : > { %v571_v25 = vpop.permute.xlu0 %570 }
 0x198   : > { %v573_v26 = vmul.f32 %v2004_v24, %v571_v25 }
 0x19a   : > { %575 = vrot.lane.b32.xlu1 %v573_v26, %s2223_s27 }
 0x19b   : > { %v566_v27 = vpop.permute.xlu0 %565 }
 0x19c   : > { %v568_v28 = vmul.f32 %v2004_v24, %v566_v27 }
 0x20c   : > { %v576_v29 = vpop.permute.xlu1 %575 }
 0x20d   : > { %v578_v30 = vadd.f32 %v576_v29, %v568_v28 }
 0x20f   : > { %2005 = vtanh.f32 %v578_v30  ;;  %v675_v46 = vrot.slane %v578_v30, 6 }
 0x21c   : > { %v2006_v31 = vpop.eup %2005 }
 0x21d   : > { %581 = vrot.lane.b32.xlu1 %v2006_v31, %s2222_s21 }
 0x28f   : > { %v582_v32 = vpop.permute.xlu1 %581 }
 0x290   : > { %v584_v33 = vmul.f32 %v2004_v24, %v582_v32 }
 0x292   : > { %586 = vrot.lane.b32.xlu0 %v584_v33, %s2223_s27 }
 0x304   : > { %v587_v34 = vpop.permute.xlu0 %586 }
 0x305   : > { %590 = vst.msk [vmem:[#allocation4] sm:$0x3] %vm589_vm4, %v587_v34  ;;  %1834 = vmatmul.mubr.msk.f32.vlgmr.msra.gmra.mxu0 %vm482_vm3, %v587_v34 }
 0x306   : > { %1848 = vmatpush3.msra.mxu0 %v2389_v2  ;;  %1855 = vmatprep.mubr.msk.f32.mxu0 %vm2221_vm2, %v2220_v4 }
 0x307   : > { %1849 = vmatprep.subr.mxu0 %v2220_v4 }
 0x308   : > { %1850 = vmatpush3.msra.mxu0 %v2399_v6 }
 0x309   : > { %1851 = vmatprep.subr.mxu0 %v2220_v4 }
 0x30a   : > { %1852 = vmatpush3.msra.mxu0 %v2405_v8 }
 0x30b   : > { %1853 = vmatprep.subr.mxu0 %v2220_v4 }
 0x30c   : > { %1854 = vmatpush3.msra.mxu0 %v2412_v9 }
 0x30d   : > { %1869 = vmatprep.subr.mxu0 %v2220_v4 }
 0x3c5   : > { %v659_v35 = vpop.f32.mrf.mxu0 }
 0x3c6   : > { %v664_v36 = vrot.slane %v659_v35, 6 }
 0x3c7   : > { %v1835_v37 = vpop.f32.mrf.mxu0 }
 0x3c8   : > { %v666_v38 = vadd.f32 %v664_v36, %v2447_v15 }
 0x3ca   : > { %2007 = vtanh.f32 %v666_v38  ;;  %v1722_v40 = vmul.f32 -1.442695, %v666_v38 }
 0x3cc   : > { %2009 = vpow2.f32 %v1722_v40 }
 0x3d7   : > { %v2008_v39 = vpop.eup %2007 }
 0x3d8   : > { %679 = vrot.lane.b32.xlu1 %v2008_v39, %s2222_s21 }
 0x3d9   : > { %v2010_v41 = vpop.eup %2009 }
 0x3da   : > { %v670_v42 = vadd.f32 1.0, %v2010_v41 }
 0x3dc   : > { %2011 = vrcp.f32 %v670_v42 }
 0x3e9   : > { %v2012_v43 = vpop.eup %2011 }
 0x3ea   : > { %v677_v47 = vmul.f32 %v2012_v43, %v675_v46 }
 0x44a   : > { %v680_v44 = vpop.permute.xlu1 %679 }
 0x44b   : > { %v682_v45 = vmul.f32 %v2012_v43, %v680_v44 }
 0x44d   : > { %684 = vrot.lane.b32.xlu0 %v682_v45, %s2223_s27 }
 0x4bf   : > { %v685_v48 = vpop.permute.xlu0 %684 }
 0x4c0   : > { %v687_v49 = vadd.f32 %v685_v48, %v677_v47 }
 0x4c2   : > { %2013 = vtanh.f32 %v687_v49  ;;  %v787_v3 = vrot.slane %v687_v49, 6 }
 0x4cf   : > { %v2014_v50 = vpop.eup %2013 }
 0x4d0   : > { %690 = vrot.lane.b32.xlu1 %v2014_v50, %s2222_s21 }
 0x542   : > { %v691_v51 = vpop.permute.xlu1 %690 }
 0x543   : > { %v2471_v52 = vmul.f32 %v2012_v43, %v691_v51 }
 0x545   : > { %v700_v53 = vrot.slane %v2471_v52, 2 }
 0x547   : > { %701 = vrot.lane.b32.xlu0 %v700_v53, %s2223_s27 }
 0x5b9   : > { %v702_v54 = vpop.permute.xlu0 %701 }
 0x5ba   : > { %1845 = vmatmul.mubr.msk.f32.vlgmr.msra.gmra.mxu1 %vm482_vm3, %v702_v54 }
 0x5bb   : > { %1859 = vmatpush3.msra.mxu1 %v2389_v2  ;;  %1866 = vmatprep.mubr.msk.f32.mxu1 %vm2221_vm2, %v2220_v4 }
 0x5bc   : > { %1860 = vmatprep.subr.mxu1 %v2220_v4 }
 0x5bd   : > { %1861 = vmatpush3.msra.mxu1 %v2399_v6 }
 0x5be   : > { %1862 = vmatprep.subr.mxu1 %v2220_v4 }
 0x5bf   : > { %1863 = vmatpush3.msra.mxu1 %v2405_v8 }
 0x5c0   : > { %1864 = vmatprep.subr.mxu1 %v2220_v4 }
 0x5c1   : > { %1865 = vmatpush3.msra.mxu1 %v2412_v9 }
 0x5c2   : > { %1880 = vmatprep.subr.mxu1 %v2220_v4 }
 0x67a   : > { %v771_v55 = vpop.f32.mrf.mxu1 }
 0x67b   : > { %v776_v56 = vrot.slane %v771_v55, 4 }
 0x67c   : > { %v1846_v57 = vpop.f32.mrf.mxu1 }
 0x67d   : > { %v778_v58 = vadd.f32 %v776_v56, %v2447_v15 }
 0x67f   : > { %2015 = vtanh.f32 %v778_v58  ;;  %v1724_v60 = vmul.f32 -1.442695, %v778_v58 }
 0x681   : > { %2017 = vpow2.f32 %v1724_v60 }
 0x68c   : > { %v2016_v59 = vpop.eup %2015 }
 0x68d   : > { %791 = vrot.lane.b32.xlu1 %v2016_v59, %s2222_s21 }
 0x68e   : > { %v2018_v61 = vpop.eup %2017 }
 0x68f   : > { %v782_v62 = vadd.f32 1.0, %v2018_v61 }
 0x691   : > { %2019 = vrcp.f32 %v782_v62 }
 0x69e   : > { %v2020_v63 = vpop.eup %2019 }
 0x69f   : > { %v789_v5 = vmul.f32 %v2020_v63, %v787_v3 }
 0x6ff   : > { %v792_v0 = vpop.permute.xlu1 %791 }
 0x700   : > { %v794_v1 = vmul.f32 %v2020_v63, %v792_v0 }
 0x702   : > { %796 = vrot.lane.b32.xlu0 %v794_v1, %s2223_s27 }
 0x774   : > { %v797_v7 = vpop.permute.xlu0 %796 }
 0x775   : > { %v799_v10 = vadd.f32 %v797_v7, %v789_v5 }
 0x777   : > { %2021 = vtanh.f32 %v799_v10  ;;  %v899_v29 = vrot.slane %v799_v10, 6 }
 0x784   : > { %v2022_v11 = vpop.eup %2021 }
 0x785   : > { %802 = vrot.lane.b32.xlu1 %v2022_v11, %s2222_s21 }
 0x7f7   : > { %v803_v12 = vpop.permute.xlu1 %802 }
 0x7f8   : > { %v2490_v14 = vmul.f32 %v2020_v63, %v803_v12 }
 0x7fa   : > { %v812_v16 = vrot.slane %v2490_v14, 4 }
 0x7fc   : > { %813 = vrot.lane.b32.xlu0 %v812_v16, %s2223_s27 }
 0x86e   : > { %v814_v17 = vpop.permute.xlu0 %813 }
 0x86f   : > { %1856 = vmatmul.mubr.msk.f32.vlgmr.msra.gmra.mxu0 %vm482_vm3, %v814_v17 }
 0x870   : > { %1870 = vmatpush3.msra.mxu0 %v2389_v2  ;;  %1877 = vmatprep.mubr.msk.f32.mxu0 %vm2221_vm2, %v2220_v4 }
 0x871   : > { %1871 = vmatprep.subr.mxu0 %v2220_v4 }
 0x872   : > { %1872 = vmatpush3.msra.mxu0 %v2399_v6 }
 0x873   : > { %1873 = vmatprep.subr.mxu0 %v2220_v4 }
 0x874   : > { %1874 = vmatpush3.msra.mxu0 %v2405_v8 }
 0x875   : > { %1875 = vmatprep.subr.mxu0 %v2220_v4 }
 0x876   : > { %1876 = vmatpush3.msra.mxu0 %v2412_v9 }
 0x877   : > { %1891 = vmatprep.subr.mxu0 %v2220_v4 }
 0x92f   : > { %v883_v18 = vpop.f32.mrf.mxu0 }
 0x930   : > { %v888_v19 = vrot.slane %v883_v18, 2 }
 0x931   : > { %v1857_v20 = vpop.f32.mrf.mxu0 }
 0x932   : > { %v890_v21 = vadd.f32 %v888_v19, %v2447_v15 }
 0x934   : > { %2023 = vtanh.f32 %v890_v21  ;;  %v1726_v23 = vmul.f32 -1.442695, %v890_v21 }
 0x936   : > { %2025 = vpow2.f32 %v1726_v23 }
 0x941   : > { %v2024_v22 = vpop.eup %2023 }
 0x942   : > { %903 = vrot.lane.b32.xlu1 %v2024_v22, %s2222_s21 }
 0x943   : > { %v2026_v24 = vpop.eup %2025 }
 0x944   : > { %v894_v25 = vadd.f32 1.0, %v2026_v24 }
 0x946   : > { %2027 = vrcp.f32 %v894_v25 }
 0x953   : > { %v2028_v26 = vpop.eup %2027 }
 0x954   : > { %v901_v30 = vmul.f32 %v2028_v26, %v899_v29 }
 0x9b4   : > { %v904_v27 = vpop.permute.xlu1 %903 }
 0x9b5   : > { %v906_v28 = vmul.f32 %v2028_v26, %v904_v27 }
 0x9b7   : > { %908 = vrot.lane.b32.xlu0 %v906_v28, %s2223_s27 }
 0xa29   : > { %v909_v31 = vpop.permute.xlu0 %908 }
 0xa2a   : > { %v911_v32 = vadd.f32 %v909_v31, %v901_v30 }
 0xa2c   : > { %2029 = vtanh.f32 %v911_v32  ;;  %v1008_v47 = vrot.slane %v911_v32, 6 }
 0xa39   : > { %v2030_v15 = vpop.eup %2029 }
 0xa3a   : > { %914 = vrot.lane.b32.xlu1 %v2030_v15, %s2222_s21 }
 0xaac   : > { %v915_v33 = vpop.permute.xlu1 %914 }
 0xaad   : > { %v2509_v34 = vmul.f32 %v2028_v26, %v915_v33 }
 0xaaf   : > { %v924_v35 = vrot.slane %v2509_v34, 6 }
 0xab1   : > { %925 = vrot.lane.b32.xlu0 %v924_v35, %s2223_s27 }
 0xb23   : > { %v926_v36 = vpop.permute.xlu0 %925 }
 0xb24   : > { %1867 = vmatmul.mubr.msk.f32.vlgmr.msra.gmra.mxu1 %vm482_vm3, %v926_v36 }
 0xb25   : > { %1881 = vmatpush3.msra.mxu1 %v2389_v2  ;;  %1888 = vmatprep.mubr.msk.f32.mxu1 %vm2221_vm2, %v2220_v4 }
 0xb26   : > { %1882 = vmatprep.subr.mxu1 %v2220_v4 }
 0xb27   : > { %1883 = vmatpush3.msra.mxu1 %v2399_v6 }
 0xb28   : > { %1884 = vmatprep.subr.mxu1 %v2220_v4 }
 0xb29   : > { %1885 = vmatpush3.msra.mxu1 %v2405_v8 }
 0xb2a   : > { %1886 = vmatprep.subr.mxu1 %v2220_v4 }
 0xb2b   : > { %1887 = vmatpush3.msra.mxu1 %v2412_v9 }
 0xbe4   : > { %v995_v37 = vpop.f32.mrf.mxu1 }
 0xbe5   : > { %v999_v38 = vadd.f32 %v995_v37, %v2445_v13 }
 0xbe6   : > { %v1868_v39 = vpop.f32.mrf.mxu1 }
 0xbe7   : > { %2031 = vtanh.f32 %v999_v38  ;;  %v1728_v41 = vmul.f32 -1.442695, %v999_v38 }
 0xbe9   : > { %2033 = vpow2.f32 %v1728_v41 }
 0xbf4   : > { %v2032_v40 = vpop.eup %2031 }
 0xbf5   : > { %1012 = vrot.lane.b32.xlu1 %v2032_v40, %s2222_s21 }
 0xbf6   : > { %v2034_v42 = vpop.eup %2033 }
 0xbf7   : > { %v1003_v43 = vadd.f32 1.0, %v2034_v42 }
 0xbf9   : > { %2035 = vrcp.f32 %v1003_v43 }
 0xc06   : > { %v2036_v44 = vpop.eup %2035 }
 0xc07   : > { %v1010_v48 = vmul.f32 %v2036_v44, %v1008_v47 }
 0xc67   : > { %v1013_v45 = vpop.permute.xlu1 %1012 }
 0xc68   : > { %v1015_v46 = vmul.f32 %v2036_v44, %v1013_v45 }
 0xc6a   : > { %1017 = vrot.lane.b32.xlu0 %v1015_v46, %s2223_s27 }
 0xcdc   : > { %v1018_v49 = vpop.permute.xlu0 %1017 }
 0xcdd   : > { %v1020_v50 = vadd.f32 %v1018_v49, %v1010_v48 }
 0xcdf   : > { %2037 = vtanh.f32 %v1020_v50 }
 0xcec   : > { %v2038_v51 = vpop.eup %2037 }
 0xced   : > { %1023 = vrot.lane.b32.xlu1 %v2038_v51, %s2222_s21 }
 0xd5f   : > { %v1024_v53 = vpop.permute.xlu1 %1023 }
 0xd60   : > { %v1026_v54 = vmul.f32 %v2036_v44, %v1024_v53  ;;  %v1373_v53 = vld [vmem:[#allocation5 + $0x18] sm:$0xff] }
 0xd61   : > { %1902 = vmatprep.subr.mxu1 %v1373_v53 }
 0xd62   : > { %1028 = vrot.lane.b32.xlu0 %v1026_v54, %s2223_s27  ;;  %v1467_v54 = vld [vmem:[#allocation8 + $0x18] sm:$0xff] }
 0xdd4   : > { %v1029_v55 = vpop.permute.xlu0 %1028 }
 0xdd5   : > { %1031 = vst.msk [vmem:[#allocation4 + $0x8] sm:$0x3] %vm589_vm4, %v1029_v55  ;;  %1878 = vmatmul.mubr.msk.f32.vlgmr.msra.gmra.mxu0 %vm482_vm3, %v1029_v55  ;;  %v1372_v55 = vld [vmem:[#allocation5 + $0x10] sm:$0xff] }
 0xdd6   : > { %1892 = vmatpush3.msra.mxu0 %v2389_v2  ;;  %1899 = vmatprep.mubr.msk.f32.mxu0 %vm2221_vm2, %v2220_v4 }
 0xdd7   : > { %1893 = vmatprep.subr.mxu0 %v2220_v4 }
 0xdd8   : > { %1894 = vmatpush3.msra.mxu0 %v2399_v6 }
 0xdd9   : > { %1895 = vmatprep.subr.mxu0 %v2220_v4 }
 0xdda   : > { %1896 = vmatpush3.msra.mxu0 %v2405_v8 }
 0xddb   : > { %1897 = vmatprep.subr.mxu0 %v2220_v4  ;;  %v1116_v4 = vrot.slane %v1020_v50, 6 }
 0xddc   : > { %1898 = vmatpush3.msra.mxu0 %v2412_v9 }
 0xddd   : > { %1913 = vmatprep.subr.mxu0 %v1467_v54 }
 0xe95   : > { %v1100_v56 = vpop.f32.mrf.mxu0 }
 0xe96   : > { %v1105_v57 = vrot.slane %v1100_v56, 6  ;;  %v1466_v56 = vld [vmem:[#allocation8 + $0x10] sm:$0xff] }
 0xe97   : > { %v1879_v58 = vpop.f32.mrf.mxu0 }
 0xe98   : > { %v1107_v2 = vadd.f32 %v1105_v57, %v2445_v13  ;;  %v1371_v57 = vld [vmem:[#allocation5 + $0x8] sm:$0xff] }
 0xe99   : > { %v1465_v58 = vld [vmem:[#allocation8 + $0x8] sm:$0xff] }
 0xe9a   : > { %2039 = vtanh.f32 %v1107_v2  ;;  %v1730_v60 = vmul.f32 -1.442695, %v1107_v2  ;;  %v1464_v2 = vld [vmem:[#allocation8] sm:$0xff] }
 0xe9c   : > { %2041 = vpow2.f32 %v1730_v60 }
 0xea7   : > { %v2040_v59 = vpop.eup %2039 }
 0xea8   : > { %1120 = vrot.lane.b32.xlu1 %v2040_v59, %s2222_s21 }
 0xea9   : > { %v2042_v6 = vpop.eup %2041 }
 0xeaa   : > { %v1111_v61 = vadd.f32 1.0, %v2042_v6 }
 0xeac   : > { %2043 = vrcp.f32 %v1111_v61 }
 0xeb9   : > { %v2044_v62 = vpop.eup %2043 }
 0xeba   : > { %v1118_v9 = vmul.f32 %v2044_v62, %v1116_v4  ;;  %v1735_v4 = vld [vmem:[%s2679_s5] ss:$0 sm:$0xff] }
 0xf1a   : > { %v1121_v8 = vpop.permute.xlu1 %1120 }
 0xf1b   : > { %v1123_v63 = vmul.f32 %v2044_v62, %v1121_v8 }
 0xf1d   : > { %1125 = vrot.lane.b32.xlu0 %v1123_v63, %s2223_s27 }
 0xf8f   : > { %v1126_v0 = vpop.permute.xlu0 %1125 }
 0xf90   : > { %v1128_v1 = vadd.f32 %v1126_v0, %v1118_v9  ;;  %v1738_v9 = vld [vmem:[%s2681_s7] ss:$0 sm:$0xff] }
 0xf92   : > { %2045 = vtanh.f32 %v1128_v1  ;;  %v1227_v26 = vrot.slane %v1128_v1, 6 }
 0xf9f   : > { %v2046_v3 = vpop.eup %2045 }
 0xfa0   : > { %1131 = vrot.lane.b32.xlu1 %v2046_v3, %s2222_s21 }
0x1012   : > { %v1132_v5 = vpop.permute.xlu1 %1131 }
0x1013   : > { %v2543_v7 = vmul.f32 %v2044_v62, %v1132_v5 }
0x1015   : > { %v1140_v10 = vrot.slane %v2543_v7, 2 }
0x1017   : > { %1141 = vrot.lane.b32.xlu0 %v1140_v10, %s2223_s27 }
0x1089   : > { %v1142_v11 = vpop.permute.xlu0 %1141 }
0x108a   : > { %1889 = vmatmul.mubr.msk.f32.vlgmr.msra.gmra.mxu1 %vm482_vm3, %v1142_v11 }
0x108b   : > { %1903 = vmatpush3.msra.mxu1 %v1373_v53 }
0x108c   : > { %1904 = vmatprep.subr.mxu1 %v1372_v55 }
0x108d   : > { %1905 = vmatpush3.msra.mxu1 %v1372_v55 }
0x108e   : > { %1906 = vmatprep.subr.mxu1 %v1371_v57 }
0x108f   : > { %1907 = vmatpush3.msra.mxu1 %v1371_v57 }
0x114a   : > { %v1211_v12 = vpop.f32.mrf.mxu1 }
0x114b   : > { %v1216_v16 = vrot.slane %v1211_v12, 4 }
0x114c   : > { %v1890_v17 = vpop.f32.mrf.mxu1 }
0x114d   : > { %v1218_v18 = vadd.f32 %v1216_v16, %v2445_v13 }
0x114f   : > { %2047 = vtanh.f32 %v1218_v18  ;;  %v1732_v20 = vmul.f32 -1.442695, %v1218_v18 }
0x1151   : > { %2049 = vpow2.f32 %v1732_v20 }
0x115c   : > { %v2048_v19 = vpop.eup %2047 }
0x115d   : > { %1231 = vrot.lane.b32.xlu1 %v2048_v19, %s2222_s21 }
0x115e   : > { %v2050_v21 = vpop.eup %2049 }
0x115f   : > { %v1222_v22 = vadd.f32 1.0, %v2050_v21 }
0x1161   : > { %2051 = vrcp.f32 %v1222_v22 }
0x116e   : > { %v2052_v23 = vpop.eup %2051 }
0x116f   : > { %v1229_v27 = vmul.f32 %v2052_v23, %v1227_v26 }
0x11cf   : > { %v1232_v24 = vpop.permute.xlu1 %1231 }
0x11d0   : > { %v1234_v25 = vmul.f32 %v2052_v23, %v1232_v24 }
0x11d2   : > { %1236 = vrot.lane.b32.xlu0 %v1234_v25, %s2223_s27 }
0x1244   : > { %v1237_v28 = vpop.permute.xlu0 %1236 }
0x1245   : > { %v1239_v29 = vadd.f32 %v1237_v28, %v1229_v27 }
0x1247   : > { %2053 = vtanh.f32 %v1239_v29 }
0x1254   : > { %v2054_v30 = vpop.eup %2053 }
0x1255   : > { %1242 = vrot.lane.b32.xlu1 %v2054_v30, %s2222_s21 }
0x12c7   : > { %v1243_v31 = vpop.permute.xlu1 %1242 }
0x12c8   : > { %v1245_v32 = vmul.f32 %v2052_v23, %v1243_v31 }
0x12ca   : > { %v1251_v15 = vrot.slane %v1245_v32, 4 }
0x12cc   : > { %1252 = vrot.lane.b32.xlu0 %v1251_v15, %s2223_s27 }
0x133e   : > { %v1253_v33 = vpop.permute.xlu0 %1252 }
0x133f   : > { %1900 = vmatmul.mubr.msk.f32.vlgmr.msra.gmra.mxu0 %vm482_vm3, %v1253_v33 }
0x1340   : > { %1914 = vmatpush3.msra.mxu0 %v1467_v54 }
0x1341   : > { %1915 = vmatprep.subr.mxu0 %v1466_v56 }
0x1342   : > { %1916 = vmatpush3.msra.mxu0 %v1466_v56 }
0x1343   : > { %1917 = vmatprep.subr.mxu0 %v1465_v58 }
0x1344   : > { %1918 = vmatpush3.msra.mxu0 %v1465_v58 }
0x1345   : > { %1919 = vmatprep.subr.mxu0 %v1464_v2 }
0x1346   : > { %1920 = vmatpush3.msra.mxu0 %v1464_v2 }
0x13ff   : > { %v1322_v35 = vpop.f32.mrf.mxu0 }
0x1400   : > { %v1327_v36 = vrot.slane %v1322_v35, 2 }
0x1401   : > { %v1901_v37 = vpop.f32.mrf.mxu0 }
0x1402   : > { %v1329_v38 = vadd.f32 %v1327_v36, %v2445_v13  ;;  %v1338_v13 = vrot.slane %v1239_v29, 6 }
0x1404   : > { %2055 = vtanh.f32 %v1329_v38  ;;  %v1734_v40 = vmul.f32 -1.442695, %v1329_v38 }
0x1406   : > { %2057 = vpow2.f32 %v1734_v40 }
0x1411   : > { %v2056_v39 = vpop.eup %2055 }
0x1412   : > { %1342 = vrot.lane.b32.xlu1 %v2056_v39, %s2222_s21 }
0x1413   : > { %v2058_v41 = vpop.eup %2057 }
0x1414   : > { %v1333_v42 = vadd.f32 1.0, %v2058_v41 }
0x1416   : > { %2059 = vrcp.f32 %v1333_v42 }
0x1423   : > { %v2060_v43 = vpop.eup %2059 }
0x1424   : > { %v1340_v46 = vmul.f32 %v2060_v43, %v1338_v13 }
0x1484   : > { %v1343_v44 = vpop.permute.xlu1 %1342 }
0x1485   : > { %v1345_v45 = vmul.f32 %v2060_v43, %v1343_v44 }
0x1487   : > { %1347 = vrot.lane.b32.xlu0 %v1345_v45, %s2223_s27 }
0x148b   : > { %695 = vrot.lane.b32.xlu0 %v2471_v52, %s2223_s27 }
0x148f   : > { %919 = vrot.lane.b32.xlu0 %v2509_v34, %s2223_s27 }
0x1493   : > { %1247 = vrot.lane.b32.xlu0 %v1245_v32, %s2223_s27 }
0x14f9   : > { %v1348_v47 = vpop.permute.xlu0 %1347 }
0x14fa   : > { %v1350_v48 = vadd.f32 %v1348_v47, %v1340_v46 }
0x14fc   : > { %2061 = vtanh.f32 %v1350_v48  ;;  %1364 = vrot.lane.b32.xlu0 %v1350_v48, %s2224_s28  ;;  %s2591_s28 = scalar_lea.hbm %s2682_s8, %s1749_s29 }
0x14fd   : > { %v696_v49 = vpop.permute.xlu0 %695 }
0x14fe   : > { %699 = vst.msk [vmem:[#allocation4] sm:$0xc] %vm698_vm5, %v696_v49 }
0x1501   : > { %v920_v50 = vpop.permute.xlu0 %919 }
0x1502   : > { %923 = vst.msk [vmem:[#allocation4] sm:$0xc0] %vm922_vm6, %v920_v50 }
0x1505   : > { %v1248_v52 = vpop.permute.xlu0 %1247 }
0x1506   : > { %1250 = vst.msk [vmem:[#allocation4 + $0x8] sm:$0x30] %vm810_vm7, %v1248_v52 }
0x1509   : > { %v2062_v34 = vpop.eup %2061 }
0x150a   : > { %1353 = vrot.lane.b32.xlu1 %v2062_v34, %s2222_s21  ;;  %s2115_s21 = scalar_lea.vmem %s2594_s26, 256 }
0x150b   : > { %p2116_p13 = scmp.ne.s32.totalorder %s2594_s26, %s2115_s21 }
0x150d   : > { %p2117_p8 = pnand %p2116_p13, %p2317_p5 }
0x150e   : > { %807 = vrot.lane.b32.xlu1 %v2490_v14, %s2223_s27  ;;  %v1370_v14 = vld [vmem:[#allocation5] sm:$0xff] }
0x150f   : > { %1908 = vmatprep.subr.mxu1 %v1370_v14  ;;  %p2118_p12 = pneg %p2117_p8 }
0x1510   : > { %1909 = vmatpush3.msra.mxu1 %v1370_v14 }
0x1512   : > { %1136 = vrot.lane.b32.xlu1 %v2543_v7, %s2223_s27 }
0x156e   : > { %v1365_v51 = vpop.permute.xlu0 %1364 }
0x156f   : > { %1367 = vst.msk [vmem:[#allocation3 - $0x6] sm:$0xc0] %vm922_vm6, %v1365_v51 }
0x157c   : > { %v1354_v59 = vpop.permute.xlu1 %1353 }
0x157d   : > { %v1356_v60 = vmul.f32 %v2060_v43, %v1354_v59 }
0x157f   : > { %1358 = vrot.lane.b32.xlu1 %v1356_v60, %s2223_s27  ;;  %s2225_s27 = smov [#allocation10]  }
0x1580   : > { %v808_v6 = vpop.permute.xlu1 %807  ;;  %s2119_s0 = sshll.u32 %s2225_s27, 4  ;;  %s2120_s0 = int_to_ptr.vmem [resolvable:$false] %s2119_s0 }
0x1581   : > { %811 = vst.msk [vmem:[#allocation4] sm:$0x30] %vm810_vm7, %v808_v6  ;;  %s2121_s1 = scalar_lea.vmem %s2120_s0, 512  ;;  %p2122_p1 = scmp.lt.s32.totalorder %s2594_s26, %s2120_s0 }
0x1582   : > { %p2123_p2 = scmp.lt.s32.totalorder %s2121_s1, %s2115_s21 }
0x1584   : > { %v1137_v61 = vpop.permute.xlu1 %1136  ;;  %p2124_p4 = por %p2123_p2, %p2122_p1 }
0x1585   : > { %1139 = vst.msk [vmem:[#allocation4 + $0x8] sm:$0xc] %vm698_vm5, %v1137_v61 }
0x1586   : > { %p2125_p3 = pnand %p2124_p4, %p2118_p12 }
0x1588   : > { %v1368_v62 = vld [vmem:[#allocation4] sm:$0xff] }
0x1589   : > { %1910 = vmatprep.mubr.msk.f32.mxu1 %vm482_vm3, %v1368_v62  ;;  %1921 = vmatprep.mubr.msk.f32.mxu0 %vm482_vm3, %v1368_v62 }
0x15f1   : > { %v1359_v8 = vpop.permute.xlu1 %1358 }
0x15f2   : > { %1361 = vst.msk [vmem:[#allocation4 + $0x8] sm:$0xc0] %vm922_vm6, %v1359_v8  ;;  %1362 = vst.msk [vmem:[#allocation2 - $0x6] sm:$0xc0] %vm922_vm6, %v1359_v8 }
0x15f9   : > { %v1369_v63 = vld [vmem:[#allocation4 + $0x8] sm:$0xff] }
0x15fa   : > { %1911 = vmatmul.mubr.msk.f32.vlgmr.msra.gmra.mxu1 %vm482_vm3, %v1369_v63  ;;  %1922 = vmatmul.mubr.msk.f32.vlgmr.msra.gmra.mxu0 %vm482_vm3, %v1369_v63 }
0x16ba   : > { %v1912_v0 = vpop.f32.mrf.mxu1  ;;  %v1923_v1 = vpop.f32.mrf.mxu0 }
0x16bb   : > { %v1459_v3 = vadd.f32 %v1912_v0, %v1735_v4  ;;  %v1547_v5 = vadd.f32 %v1923_v1, %v1738_v9 }
0x16bc   : > { %v1453_v7 = vpop.f32.mrf.mxu1  ;;  %v1541_v10 = vpop.f32.mrf.mxu0 }
0x16bd   : > { %1463 = vst [vmem:[%s2377_s14 + $0x8] sm:$0xff] %v1459_v3  ;;  %1551 = vst [vmem:[%s2379_s16 + $0x8] sm:$0xff] %v1547_v5  ;;  %v1454_v11 = vadd.f32 %v1735_v4, %v1453_v7  ;;  %v1542_v12 = vadd.f32 %v1738_v9, %v1541_v10 }
0x16bf   : > { %1462 = vst [vmem:[%s2377_s14] sm:$0xff] %v1454_v11  ;;  %1550 = vst [vmem:[%s2379_s16] sm:$0xff] %v1542_v12 }
0x16c0   : > { %2128 = shalt.err (!%p2125_p3)
}
0x16c1   : > { %s2129_s14 = scalar_lea.hbm %s2591_s28, 256  ;;  %s2133_s13 = scalar_lea.hbm %s2682_s8, 512 }
0x16c2   : > { %p2130_p7 = scmp.ne.s32.totalorder %s2591_s28, %s2129_s14  ;;  %p2134_p6 = scmp.lt.s32.totalorder %s2591_s28, %s2682_s8 }
0x16c3   : > { %p2135_p10 = scmp.lt.s32.totalorder %s2133_s13, %s2129_s14 }
0x16c4   : > { %p2131_p9 = pnand %p2130_p7, %p2317_p5 }
0x16c5   : > { %p2136_p11 = por %p2135_p10, %p2134_p6 }
0x16c6   : > { %p2132_p0 = pneg %p2131_p9 }
0x16c8   : > { %p2137_p13 = pnand %p2136_p11, %p2132_p0 }
0x16ca   : > { %2140 = shalt.err (!%p2137_p13)
}
0x16cb   : > { %s2226_s0 = smov 128   ;;  %s2227_s1 = smov 8  }
0x16cc   : > { %1932 = dma.vmem_to_hbm [thread:$0]  (%p2317_p5), %s2594_s26, 256, %s2591_s28, %s1553_s24, %s2226_s0, %s2226_s0, %s2227_s1  }
0x16cd   : > { %s1558_s21 = scalar_lea.sflag [#allocation12], %s2370_s23  ;;  %s2141_s14 = scalar_lea.vmem %s2603_s17, 256 }
0x16ce   : > { %p2142_p8 = scmp.ne.s32.totalorder %s2603_s17, %s2141_s14  ;;  %s2228_s16 = smov [#allocation11]  }
0x16cf   : > { %s2145_s29 = sshll.u32 %s2228_s16, 4  ;;  %s2146_s29 = int_to_ptr.vmem [resolvable:$false] %s2145_s29 }
0x16d0   : > { %p2143_p12 = pnand %p2142_p8, %p2317_p5  ;;  %s2147_s13 = scalar_lea.vmem %s2146_s29, 512 }
0x16d1   : > { %p2148_p2 = scmp.lt.s32.totalorder %s2603_s17, %s2146_s29  ;;  %p2149_p4 = scmp.lt.s32.totalorder %s2147_s13, %s2141_s14 }
0x16d2   : > { %p2144_p1 = pneg %p2143_p12 }
0x16d3   : > { %p2150_p3 = por %p2149_p4, %p2148_p2 }
0x16d5   : > { %p2151_p7 = pnand %p2150_p3, %p2144_p1 }
0x16d7   : > { %2154 = shalt.err (!%p2151_p7)
}
0x16d8   : > { %s2155_s26 = scalar_lea.hbm %s2601_s25, 256  ;;  %s2159_s24 = scalar_lea.hbm %s2683_s9, 512 }
0x16d9   : > { %p2156_p9 = scmp.ne.s32.totalorder %s2601_s25, %s2155_s26  ;;  %p2160_p10 = scmp.lt.s32.totalorder %s2601_s25, %s2683_s9 }
0x16da   : > { %p2161_p11 = scmp.lt.s32.totalorder %s2159_s24, %s2155_s26 }
0x16db   : > { %p2157_p0 = pnand %p2156_p9, %p2317_p5 }
0x16dc   : > { %p2162_p13 = por %p2161_p11, %p2160_p10 }
0x16dd   : > { %p2158_p6 = pneg %p2157_p0 }
0x16df   : > { %p2163_p8 = pnand %p2162_p13, %p2158_p6 }
0x16e1   : > { %2166 = shalt.err (!%p2163_p8)
}
0x16e2   : > { %1933 = dma.vmem_to_hbm [thread:$0]  (%p2317_p5), %s2603_s17, 256, %s2601_s25, %s1558_s21, %s2226_s0, %s2226_s0, %s2227_s1  }
0x16e3 PF: > { %p1954_p12 = scmp.ge.s32.totalorder %s2213_s12, 2  ;;  %s1602_s14 = sand.u32 1, %s2201_s30  }
0x16e4   : > { %p2698_p1 = scmp.ne.s32.totalorder %s2688_s20, 0  ;;  %s1603_s16 = scalar_lea.sflag [#allocation7], %s1602_s14 }
0x16e6   : > { %p1944_p2 = pnand %p1954_p12, %p2698_p1 }
0x16e8   : > { %p1945_p4 = pneg %p1944_p2 }
0x16ea   : > { %2192 = dma.done.wait (%p1945_p4), %s1603_s16, 256  }
0x16eb   : > { %2194 = vsyncadd (%p1945_p4), %s1603_s16, 4294967040  ;;  %s1612_s29 = scalar_lea.sflag [#allocation12], %s1602_s14 }
0x16ec   : > { %2196 = dma.done.wait (%p1945_p4), %s1612_s29, 256  }
0x16ed   : > { %2198 = vsyncadd (%p1945_p4), %s1612_s29, 4294967040  ;;  %p25_p5 = scmp.ge.s32.totalorder %s2304_s15, 4   ;;  %s2699_s30 = smov %s2205_s10 }
0x16ee   : > { %s2700_s10 = smov %s2209_s11  ;;  %s2701_s11 = smov %s2315_s18 }
0x16ef   : > { %s2702_s12 = smov %s2304_s15  ;;  %27 = sbr.rel (!%p25_p5) target bundleno = 10 (0xa), region = 117 }
0x16f4   :  { %1617 = vsyncpa [#allocation6], 1 }
0x16f5   :  { %1619 = vsyncpa [#allocation6 + $0x1], 1 }
0x16f6   :  { %1620 = vsyncpa [#allocation9], 1 }
0x16f7   :  { %1621 = vsyncpa [#allocation7], 1 }
0x16f8   :  { %1623 = vsyncpa [#allocation7 + $0x1], 1 }
0x16f9   :  { %1624 = vsyncpa [#allocation12], 1 }
0x16fa   :  { %1626 = vsyncpa [#allocation12 + $0x1], 1 }

</bundles_post_ra>
